<compile_context>
chip_gen: v7x
topology: tpu7x:2x2x1
jax: 0.10.0
libtpu: 0.0.40
codegen_flags: <defaults>
</compile_context>

<pallas_src>
import functools

import jax
import jax.numpy as jnp
from jax.experimental import pallas as pl
from jax.experimental.pallas import tpu as pltpu


def audio_attention_kernel(frame_ref, audio_ref, mask_ref,
                           wq_ref, bq_ref,
                           wa_ref, ba_ref,
                           wo_ref, bo_ref,
                           out_ref,
                           o_scratch,
                           *, num_heads: int):
    Bb, T, C = frame_ref.shape          # batch block, frame seq, frame channels
    _, S, A = audio_ref.shape           # audio seq, audio channels
    H = num_heads

    # ---- Projections: collapse the leading (batch, seq) dims (free relayout,
    # T and S are sublane multiples) so each projection is a single MXU matmul.
    # Weights arrive pre-transposed (in, out); scale is pre-folded into wq/bq.
    x = frame_ref[...].reshape(Bb * T, C)                                 # (Bb*T, C)
    a = audio_ref[...].reshape(Bb * S, A)                                 # (Bb*S, A)

    q = jnp.dot(x, wq_ref[...], preferred_element_type=jnp.float32) + bq_ref[...]
    kv = jnp.dot(a, wa_ref[...], preferred_element_type=jnp.float32) + ba_ref[...]

    # Grid-invariant head mask (H*T, C): row n = h*T + t belongs to head n // T,
    # channel c belongs to head c // Dh. DMA'd once (constant index_map input).
    head_mask = mask_ref[...]

    # ---- Per-batch-element attention. Results go straight into a VMEM scratch
    # slab so the unrolled loop's live set stays bounded.
    for b in range(Bb):
        qb = q[b * T:(b + 1) * T, :]                      # (T, C)  sublane-aligned
        kvb = kv[b * S:(b + 1) * S, :]                    # (S, C)  (k == v)

        # Stack heads along rows, zeroing other heads' channels: (H*T, C).
        q_heads = jnp.broadcast_to(qb, (H, T, C)).reshape(H * T, C) * head_mask

        # All heads' logits in ONE matmul (no explicit transpose of kv):
        #   logits[h*T + t, s] = sum_d q[t, h*Dh + d] * kv[s, h*Dh + d]
        logits = jnp.einsum("nc,sc->ns", q_heads, kvb,
                            preferred_element_type=jnp.float32)           # (H*T, S)

        # Max-stabilized softmax over S for every (head, query) row, exact divide.
        logits = logits - jnp.max(logits, axis=-1, keepdims=True)
        p = jnp.exp(logits)
        p = p / jnp.sum(p, axis=-1, keepdims=True)

        # attn @ v for all heads in ONE matmul, then fold heads back into the
        # channel dim with the mask + sublane-aligned adds (no lane concat).
        av = jnp.dot(p, kvb, preferred_element_type=jnp.float32) * head_mask  # (H*T, C)
        ob = av[0:T, :]
        for h in range(1, H):
            ob = ob + av[h * T:(h + 1) * T, :]

        o_scratch[b * T:(b + 1) * T, :] = ob              # bound live range

    # ---- Output projection over the whole batch block + one contiguous store.
    y = jnp.dot(o_scratch[...], wo_ref[...],
                preferred_element_type=jnp.float32) + bo_ref[...]         # (Bb*T, C)
    out_ref[...] = y.reshape(Bb, T, C).astype(out_ref.dtype)


def prepare_audio_attention_params(params, num_heads: int):
    """One-time param prep: transpose PyTorch (out, in) weights to (in, out)
    and fold the attention scale into the query projection."""
    frame_dim = params["wq"].shape[0]
    scale = float((frame_dim // num_heads) ** -0.5)
    return {
        "wq_t": jnp.transpose(params["wq"]) * scale,   # (C, C), scale folded
        "bq":   params["bq"] * scale,                  # (1, C), scale folded
        "wa_t": jnp.transpose(params["wa"]),           # (A, C)
        "ba":   params["ba"],                          # (1, C)
        "wo_t": jnp.transpose(params["wo"]),           # (C, C)
        "bo":   params["bo"],                          # (1, C)
    }


def audio_attention(frame, audio, prepared_params, num_heads: int,
                    batch_block=None):
    B, T, C = frame.shape
    _, S, A = audio.shape
    assert C % num_heads == 0, "frame_dim must be divisible by num_heads"
    assert T % 8 == 0, "frame sequence length must be a sublane multiple (8)"
    assert S % 8 == 0, "audio sequence length must be a sublane multiple (8)"
    Dh = C // num_heads
    H = num_heads

    # Grid-step sizing:
    #  * tiny problems (B*T <= 256): one grid step — the kernel is step-overhead
    #    bound, extra steps only pay the ~600-cycle fixed cost again.
    #  * larger problems: Bb*T ~ 256 (full MXU M), capped at 16 to bound the
    #    unrolled per-b loop, leaving >= 2 parallel steps for v7x's two TCs.
    if batch_block is None:
        if B * T <= 256:
            batch_block = B
        else:
            batch_block = max(1, min(B, 256 // T, 16))
            while B % batch_block != 0:
                batch_block -= 1
    assert B % batch_block == 0
    grid = (B // batch_block,)

    # Grid-invariant head mask, built once per call (outside the kernel) and
    # DMA'd into VMEM via a constant index_map.
    row_head = (jnp.arange(H * T, dtype=jnp.int32) // T)[:, None]
    col_head = (jnp.arange(C, dtype=jnp.int32) // Dh)[None, :]
    head_mask = (row_head == col_head).astype(jnp.float32)       # (H*T, C)

    p = prepared_params
    kernel = functools.partial(audio_attention_kernel, num_heads=num_heads)

    return pl.pallas_call(
        kernel,
        out_shape=jax.ShapeDtypeStruct((B, T, C), frame.dtype),
        grid=grid,
        in_specs=[
            pl.BlockSpec((batch_block, T, C), lambda b: (b, 0, 0)),  # frame feats
            pl.BlockSpec((batch_block, S, A), lambda b: (b, 0, 0)),  # audio feats
            pl.BlockSpec((H * T, C), lambda b: (0, 0)),              # head mask
            pl.BlockSpec((C, C), lambda b: (0, 0)),                  # frame_proj W^T * scale
            pl.BlockSpec((1, C), lambda b: (0, 0)),                  # frame_proj b * scale
            pl.BlockSpec((A, C), lambda b: (0, 0)),                  # audio_proj W^T
            pl.BlockSpec((1, C), lambda b: (0, 0)),                  # audio_proj b
            pl.BlockSpec((C, C), lambda b: (0, 0)),                  # out_proj W^T
            pl.BlockSpec((1, C), lambda b: (0, 0)),                  # out_proj b
        ],
        out_specs=pl.BlockSpec((batch_block, T, C), lambda b: (b, 0, 0)),
        scratch_shapes=[pltpu.VMEM((batch_block * T, C), jnp.float32)],
        compiler_params=pltpu.CompilerParams(
            dimension_semantics=("parallel",)),
    )(frame, audio, head_mask,
      p["wq_t"], p["bq"], p["wa_t"], p["ba"], p["wo_t"], p["bo"])


def audio_attention_ref(frame, audio, params, num_heads: int):
    """Pure-JAX reference mirroring the PyTorch forward (raw params)."""
    B, T, C = frame.shape
    Dh = C // num_heads
    scale = (C // num_heads) ** -0.5
    q = frame @ params["wq"].T + params["bq"][0]
    kv = audio @ params["wa"].T + params["ba"][0]
    q = q.reshape(B, T, num_heads, Dh).transpose(0, 2, 1, 3)
    k = kv.reshape(B, -1, num_heads, Dh).transpose(0, 2, 1, 3)
    v = k
    attn = jnp.einsum("bhtd,bhsd->bhts", q, k) * scale
    attn = jax.nn.softmax(attn, axis=-1)
    x = jnp.einsum("bhts,bhsd->bhtd", attn, v).transpose(0, 2, 1, 3).reshape(B, T, C)
    return x @ params["wo"].T + params["bo"][0]


if __name__ == "__main__":
    # Small shapes consistent with the module's forward.
    B, T, S = 2, 16, 8
    frame_dim, audio_dim, num_heads = 64, 32, 8

    key = jax.random.PRNGKey(0)
    keys = jax.random.split(key, 8)

    # Deterministic parameter init (PyTorch Linear stores W as (out, in)).
    params = {
        "wq": jax.random.normal(keys[0], (frame_dim, frame_dim), jnp.float32) * 0.05,
        "bq": jax.random.normal(keys[1], (1, frame_dim), jnp.float32) * 0.05,
        "wa": jax.random.normal(keys[2], (frame_dim, audio_dim), jnp.float32) * 0.05,
        "ba": jax.random.normal(keys[3], (1, frame_dim), jnp.float32) * 0.05,
        "wo": jax.random.normal(keys[4], (frame_dim, frame_dim), jnp.float32) * 0.05,
        "bo": jax.random.normal(keys[5], (1, frame_dim), jnp.float32) * 0.05,
    }

    frame = jax.random.normal(keys[6], (B, T, frame_dim), jnp.float32)
    audio = jax.random.normal(keys[7], (B, S, audio_dim), jnp.float32)

    # One-time parameter preparation (transpose + scale fold), reused per call.
    prepared = prepare_audio_attention_params(params, num_heads)

    out = audio_attention(frame, audio, prepared, num_heads)
    out = jax.block_until_ready(out)

    ref = audio_attention_ref(frame, audio, params, num_heads)
    assert out.shape == (B, T, frame_dim)
    assert jnp.allclose(out, ref, atol=1e-4, rtol=1e-4), "mismatch vs reference"

    print("KERNEL_OK")
</pallas_src>

<mosaic_0001>
module attributes {stable_mosaic.version = 11 : i64} {
  func.func @audio_attention_kernel(%arg0: i32, %arg1: memref<2x16x64xf32, #tpu.memory_space<vmem>>, %arg2: memref<2x8x32xf32, #tpu.memory_space<vmem>>, %arg3: memref<128x64xf32, #tpu.memory_space<vmem>>, %arg4: memref<64x64xf32, #tpu.memory_space<vmem>>, %arg5: memref<1x64xf32, #tpu.memory_space<vmem>>, %arg6: memref<32x64xf32, #tpu.memory_space<vmem>>, %arg7: memref<1x64xf32, #tpu.memory_space<vmem>>, %arg8: memref<64x64xf32, #tpu.memory_space<vmem>>, %arg9: memref<1x64xf32, #tpu.memory_space<vmem>>, %arg10: memref<2x16x64xf32, #tpu.memory_space<vmem>>, %arg11: memref<32x64xf32, #tpu.memory_space<vmem>>) attributes {dimension_semantics = [#tpu.dimension_semantics<parallel>], iteration_bounds = array<i64: 1>, scalar_prefetch = 0 : i64, scratch_operands = 1 : i64, tpu.core_type = #tpu.core_type<tc>, window_params = [{transform_indices = @transform_0, window_bounds = array<i64: 2, 16, 64>}, {transform_indices = @transform_1, window_bounds = array<i64: 2, 8, 32>}, {pipeline_mode = #tpu.pipeline_mode<synchronous>, transform_indices = @transform_2, window_bounds = array<i64: 128, 64>}, {pipeline_mode = #tpu.pipeline_mode<synchronous>, transform_indices = @transform_3, window_bounds = array<i64: 64, 64>}, {pipeline_mode = #tpu.pipeline_mode<synchronous>, transform_indices = @transform_4, window_bounds = array<i64: 1, 64>}, {pipeline_mode = #tpu.pipeline_mode<synchronous>, transform_indices = @transform_5, window_bounds = array<i64: 32, 64>}, {pipeline_mode = #tpu.pipeline_mode<synchronous>, transform_indices = @transform_6, window_bounds = array<i64: 1, 64>}, {pipeline_mode = #tpu.pipeline_mode<synchronous>, transform_indices = @transform_7, window_bounds = array<i64: 64, 64>}, {pipeline_mode = #tpu.pipeline_mode<synchronous>, transform_indices = @transform_8, window_bounds = array<i64: 1, 64>}, {transform_indices = @transform_9, window_bounds = array<i64: 2, 16, 64>}]} {
    %c0 = arith.constant 0 : index
    %c0_0 = arith.constant 0 : index
    %c0_1 = arith.constant 0 : index
    %0 = vector.load %arg1[%c0, %c0_0, %c0_1] : memref<2x16x64xf32, #tpu.memory_space<vmem>>, vector<2x16x64xf32>
    %1 = vector.shape_cast %0 : vector<2x16x64xf32> to vector<32x64xf32>
    %c0_2 = arith.constant 0 : index
    %c0_3 = arith.constant 0 : index
    %c0_4 = arith.constant 0 : index
    %2 = vector.load %arg2[%c0_2, %c0_3, %c0_4] : memref<2x8x32xf32, #tpu.memory_space<vmem>>, vector<2x8x32xf32>
    %3 = vector.shape_cast %2 : vector<2x8x32xf32> to vector<16x32xf32>
    %c0_5 = arith.constant 0 : index
    %c0_6 = arith.constant 0 : index
    %4 = vector.load %arg4[%c0_5, %c0_6] : memref<64x64xf32, #tpu.memory_space<vmem>>, vector<64x64xf32>
    %cst = arith.constant dense<0.000000e+00> : vector<32x64xf32>
    %5 = tpu.matmul %1, %4, %cst {dimension_numbers = #tpu.dot_dimension_numbers<[1], [0], [0], [1], [0, 0, 1, 1], [], []>} : vector<32x64xf32>, vector<64x64xf32>, vector<32x64xf32> -> vector<32x64xf32>
    %c0_7 = arith.constant 0 : index
    %c0_8 = arith.constant 0 : index
    %6 = vector.load %arg5[%c0_7, %c0_8] : memref<1x64xf32, #tpu.memory_space<vmem>>, vector<1x64xf32>
    %7 = vector.broadcast %6 : vector<1x64xf32> to vector<32x64xf32>
    %8 = arith.addf %5, %7 : vector<32x64xf32>
    %c0_9 = arith.constant 0 : index
    %c0_10 = arith.constant 0 : index
    %9 = vector.load %arg6[%c0_9, %c0_10] : memref<32x64xf32, #tpu.memory_space<vmem>>, vector<32x64xf32>
    %cst_11 = arith.constant dense<0.000000e+00> : vector<16x64xf32>
    %10 = tpu.matmul %3, %9, %cst_11 {dimension_numbers = #tpu.dot_dimension_numbers<[1], [0], [0], [1], [0, 0, 1, 1], [], []>} : vector<16x32xf32>, vector<32x64xf32>, vector<16x64xf32> -> vector<16x64xf32>
    %c0_12 = arith.constant 0 : index
    %c0_13 = arith.constant 0 : index
    %11 = vector.load %arg7[%c0_12, %c0_13] : memref<1x64xf32, #tpu.memory_space<vmem>>, vector<1x64xf32>
    %12 = vector.broadcast %11 : vector<1x64xf32> to vector<16x64xf32>
    %13 = arith.addf %10, %12 : vector<16x64xf32>
    %c0_14 = arith.constant 0 : index
    %c0_15 = arith.constant 0 : index
    %14 = vector.load %arg3[%c0_14, %c0_15] : memref<128x64xf32, #tpu.memory_space<vmem>>, vector<128x64xf32>
    %15 = vector.extract_strided_slice %8 {offsets = [0, 0], sizes = [16, 64], strides = [1, 1]} : vector<32x64xf32> to vector<16x64xf32>
    %16 = vector.extract_strided_slice %13 {offsets = [0, 0], sizes = [8, 64], strides = [1, 1]} : vector<16x64xf32> to vector<8x64xf32>
    %17 = vector.shape_cast %15 : vector<16x64xf32> to vector<1x16x64xf32>
    %18 = vector.broadcast %17 : vector<1x16x64xf32> to vector<8x16x64xf32>
    %19 = vector.shape_cast %18 : vector<8x16x64xf32> to vector<128x64xf32>
    %20 = arith.mulf %19, %14 : vector<128x64xf32>
    "tpu.trace_start"() <{level = 10 : i32, message = "nc,sc->ns"}> : () -> ()
    %cst_16 = arith.constant dense<0.000000e+00> : vector<128x8xf32>
    %21 = tpu.matmul %20, %16, %cst_16 {dimension_numbers = #tpu.dot_dimension_numbers<[1], [1], [0], [0], [0, 0, 1, 0], [], []>} : vector<128x64xf32>, vector<8x64xf32>, vector<128x8xf32> -> vector<128x8xf32>
    "tpu.trace_stop"() : () -> ()
    %cst_17 = arith.constant dense<0xFF800000> : vector<128xf32>
    %22 = vector.multi_reduction <maximumf>, %21, %cst_17 [1] : vector<128x8xf32> to vector<128xf32>
    %23 = vector.shape_cast %22 : vector<128xf32> to vector<128x1xf32>
    %24 = vector.broadcast %23 : vector<128x1xf32> to vector<128x8xf32>
    %25 = arith.subf %21, %24 : vector<128x8xf32>
    %26 = math.exp %25 : vector<128x8xf32>
    %cst_18 = arith.constant dense<0.000000e+00> : vector<128xf32>
    %27 = vector.multi_reduction <add>, %26, %cst_18 [1] : vector<128x8xf32> to vector<128xf32>
    %28 = vector.shape_cast %27 : vector<128xf32> to vector<128x1xf32>
    %29 = vector.broadcast %28 : vector<128x1xf32> to vector<128x8xf32>
    %30 = arith.divf %26, %29 : vector<128x8xf32>
    %cst_19 = arith.constant dense<0.000000e+00> : vector<128x64xf32>
    %31 = tpu.matmul %30, %16, %cst_19 {dimension_numbers = #tpu.dot_dimension_numbers<[1], [0], [0], [1], [0, 0, 1, 1], [], []>} : vector<128x8xf32>, vector<8x64xf32>, vector<128x64xf32> -> vector<128x64xf32>
    %32 = arith.mulf %31, %14 : vector<128x64xf32>
    %33 = vector.extract_strided_slice %32 {offsets = [0, 0], sizes = [16, 64], strides = [1, 1]} : vector<128x64xf32> to vector<16x64xf32>
    %34 = vector.extract_strided_slice %32 {offsets = [16, 0], sizes = [16, 64], strides = [1, 1]} : vector<128x64xf32> to vector<16x64xf32>
    %35 = arith.addf %33, %34 : vector<16x64xf32>
    %36 = vector.extract_strided_slice %32 {offsets = [32, 0], sizes = [16, 64], strides = [1, 1]} : vector<128x64xf32> to vector<16x64xf32>
    %37 = arith.addf %35, %36 : vector<16x64xf32>
    %38 = vector.extract_strided_slice %32 {offsets = [48, 0], sizes = [16, 64], strides = [1, 1]} : vector<128x64xf32> to vector<16x64xf32>
    %39 = arith.addf %37, %38 : vector<16x64xf32>
    %40 = vector.extract_strided_slice %32 {offsets = [64, 0], sizes = [16, 64], strides = [1, 1]} : vector<128x64xf32> to vector<16x64xf32>
    %41 = arith.addf %39, %40 : vector<16x64xf32>
    %42 = vector.extract_strided_slice %32 {offsets = [80, 0], sizes = [16, 64], strides = [1, 1]} : vector<128x64xf32> to vector<16x64xf32>
    %43 = arith.addf %41, %42 : vector<16x64xf32>
    %44 = vector.extract_strided_slice %32 {offsets = [96, 0], sizes = [16, 64], strides = [1, 1]} : vector<128x64xf32> to vector<16x64xf32>
    %45 = arith.addf %43, %44 : vector<16x64xf32>
    %46 = vector.extract_strided_slice %32 {offsets = [112, 0], sizes = [16, 64], strides = [1, 1]} : vector<128x64xf32> to vector<16x64xf32>
    %47 = arith.addf %45, %46 : vector<16x64xf32>
    %c0_20 = arith.constant 0 : index
    %c0_21 = arith.constant 0 : index
    %48 = vector.load %arg11[%c0_20, %c0_21] : memref<32x64xf32, #tpu.memory_space<vmem>>, vector<16x64xf32>
    tpu.vector_store %arg11[%c0_20, %c0_21], %47 {strides = array<i32>} : memref<32x64xf32, #tpu.memory_space<vmem>>, vector<16x64xf32>,
    %49 = vector.extract_strided_slice %8 {offsets = [16, 0], sizes = [16, 64], strides = [1, 1]} : vector<32x64xf32> to vector<16x64xf32>
    %50 = vector.extract_strided_slice %13 {offsets = [8, 0], sizes = [8, 64], strides = [1, 1]} : vector<16x64xf32> to vector<8x64xf32>
    %51 = vector.shape_cast %49 : vector<16x64xf32> to vector<1x16x64xf32>
    %52 = vector.broadcast %51 : vector<1x16x64xf32> to vector<8x16x64xf32>
    %53 = vector.shape_cast %52 : vector<8x16x64xf32> to vector<128x64xf32>
    %54 = arith.mulf %53, %14 : vector<128x64xf32>
    "tpu.trace_start"() <{level = 10 : i32, message = "nc,sc->ns"}> : () -> ()
    %cst_22 = arith.constant dense<0.000000e+00> : vector<128x8xf32>
    %55 = tpu.matmul %54, %50, %cst_22 {dimension_numbers = #tpu.dot_dimension_numbers<[1], [1], [0], [0], [0, 0, 1, 0], [], []>} : vector<128x64xf32>, vector<8x64xf32>, vector<128x8xf32> -> vector<128x8xf32>
    "tpu.trace_stop"() : () -> ()
    %cst_23 = arith.constant dense<0xFF800000> : vector<128xf32>
    %56 = vector.multi_reduction <maximumf>, %55, %cst_23 [1] : vector<128x8xf32> to vector<128xf32>
    %57 = vector.shape_cast %56 : vector<128xf32> to vector<128x1xf32>
    %58 = vector.broadcast %57 : vector<128x1xf32> to vector<128x8xf32>
    %59 = arith.subf %55, %58 : vector<128x8xf32>
    %60 = math.exp %59 : vector<128x8xf32>
    %cst_24 = arith.constant dense<0.000000e+00> : vector<128xf32>
    %61 = vector.multi_reduction <add>, %60, %cst_24 [1] : vector<128x8xf32> to vector<128xf32>
    %62 = vector.shape_cast %61 : vector<128xf32> to vector<128x1xf32>
    %63 = vector.broadcast %62 : vector<128x1xf32> to vector<128x8xf32>
    %64 = arith.divf %60, %63 : vector<128x8xf32>
    %cst_25 = arith.constant dense<0.000000e+00> : vector<128x64xf32>
    %65 = tpu.matmul %64, %50, %cst_25 {dimension_numbers = #tpu.dot_dimension_numbers<[1], [0], [0], [1], [0, 0, 1, 1], [], []>} : vector<128x8xf32>, vector<8x64xf32>, vector<128x64xf32> -> vector<128x64xf32>
    %66 = arith.mulf %65, %14 : vector<128x64xf32>
    %67 = vector.extract_strided_slice %66 {offsets = [0, 0], sizes = [16, 64], strides = [1, 1]} : vector<128x64xf32> to vector<16x64xf32>
    %68 = vector.extract_strided_slice %66 {offsets = [16, 0], sizes = [16, 64], strides = [1, 1]} : vector<128x64xf32> to vector<16x64xf32>
    %69 = arith.addf %67, %68 : vector<16x64xf32>
    %70 = vector.extract_strided_slice %66 {offsets = [32, 0], sizes = [16, 64], strides = [1, 1]} : vector<128x64xf32> to vector<16x64xf32>
    %71 = arith.addf %69, %70 : vector<16x64xf32>
    %72 = vector.extract_strided_slice %66 {offsets = [48, 0], sizes = [16, 64], strides = [1, 1]} : vector<128x64xf32> to vector<16x64xf32>
    %73 = arith.addf %71, %72 : vector<16x64xf32>
    %74 = vector.extract_strided_slice %66 {offsets = [64, 0], sizes = [16, 64], strides = [1, 1]} : vector<128x64xf32> to vector<16x64xf32>
    %75 = arith.addf %73, %74 : vector<16x64xf32>
    %76 = vector.extract_strided_slice %66 {offsets = [80, 0], sizes = [16, 64], strides = [1, 1]} : vector<128x64xf32> to vector<16x64xf32>
    %77 = arith.addf %75, %76 : vector<16x64xf32>
    %78 = vector.extract_strided_slice %66 {offsets = [96, 0], sizes = [16, 64], strides = [1, 1]} : vector<128x64xf32> to vector<16x64xf32>
    %79 = arith.addf %77, %78 : vector<16x64xf32>
    %80 = vector.extract_strided_slice %66 {offsets = [112, 0], sizes = [16, 64], strides = [1, 1]} : vector<128x64xf32> to vector<16x64xf32>
    %81 = arith.addf %79, %80 : vector<16x64xf32>
    %c16 = arith.constant 16 : index
    %c0_26 = arith.constant 0 : index
    %82 = vector.load %arg11[%c16, %c0_26] : memref<32x64xf32, #tpu.memory_space<vmem>>, vector<16x64xf32>
    tpu.vector_store %arg11[%c16, %c0_26], %81 {strides = array<i32>} : memref<32x64xf32, #tpu.memory_space<vmem>>, vector<16x64xf32>,
    %c0_27 = arith.constant 0 : index
    %c0_28 = arith.constant 0 : index
    %83 = vector.load %arg11[%c0_27, %c0_28] : memref<32x64xf32, #tpu.memory_space<vmem>>, vector<32x64xf32>
    %c0_29 = arith.constant 0 : index
    %c0_30 = arith.constant 0 : index
    %84 = vector.load %arg8[%c0_29, %c0_30] : memref<64x64xf32, #tpu.memory_space<vmem>>, vector<64x64xf32>
    %cst_31 = arith.constant dense<0.000000e+00> : vector<32x64xf32>
    %85 = tpu.matmul %83, %84, %cst_31 {dimension_numbers = #tpu.dot_dimension_numbers<[1], [0], [0], [1], [0, 0, 1, 1], [], []>} : vector<32x64xf32>, vector<64x64xf32>, vector<32x64xf32> -> vector<32x64xf32>
    %c0_32 = arith.constant 0 : index
    %c0_33 = arith.constant 0 : index
    %86 = vector.load %arg9[%c0_32, %c0_33] : memref<1x64xf32, #tpu.memory_space<vmem>>, vector<1x64xf32>
    %87 = vector.broadcast %86 : vector<1x64xf32> to vector<32x64xf32>
    %88 = arith.addf %85, %87 : vector<32x64xf32>
    %89 = vector.shape_cast %88 : vector<32x64xf32> to vector<2x16x64xf32>
    %c0_34 = arith.constant 0 : index
    %c0_35 = arith.constant 0 : index
    %c0_36 = arith.constant 0 : index
    %90 = vector.load %arg10[%c0_34, %c0_35, %c0_36] : memref<2x16x64xf32, #tpu.memory_space<vmem>>, vector<2x16x64xf32>
    tpu.vector_store %arg10[%c0_34, %c0_35, %c0_36], %89 {strides = array<i32>} : memref<2x16x64xf32, #tpu.memory_space<vmem>>, vector<2x16x64xf32>,
    return
  }
  func.func @transform_0(%arg0: i32) -> (i32, i32, i32) {
    %c0_i32 = arith.constant 0 : i32
    %c0_i32_0 = arith.constant 0 : i32
    %c0_i32_1 = arith.constant 0 : i32
    return %arg0, %c0_i32, %c0_i32_0 : i32, i32, i32
  }
  func.func @transform_1(%arg0: i32) -> (i32, i32, i32) {
    %c0_i32 = arith.constant 0 : i32
    %c0_i32_0 = arith.constant 0 : i32
    %c0_i32_1 = arith.constant 0 : i32
    return %arg0, %c0_i32, %c0_i32_0 : i32, i32, i32
  }
  func.func @transform_2(%arg0: i32) -> (i32, i32) {
    %c0_i32 = arith.constant 0 : i32
    %c0_i32_0 = arith.constant 0 : i32
    %c0_i32_1 = arith.constant 0 : i32
    return %c0_i32, %c0_i32_0 : i32, i32
  }
  func.func @transform_3(%arg0: i32) -> (i32, i32) {
    %c0_i32 = arith.constant 0 : i32
    %c0_i32_0 = arith.constant 0 : i32
    %c0_i32_1 = arith.constant 0 : i32
    return %c0_i32, %c0_i32_0 : i32, i32
  }
  func.func @transform_4(%arg0: i32) -> (i32, i32) {
    %c0_i32 = arith.constant 0 : i32
    %c0_i32_0 = arith.constant 0 : i32
    %c0_i32_1 = arith.constant 0 : i32
    return %c0_i32, %c0_i32_0 : i32, i32
  }
  func.func @transform_5(%arg0: i32) -> (i32, i32) {
    %c0_i32 = arith.constant 0 : i32
    %c0_i32_0 = arith.constant 0 : i32
    %c0_i32_1 = arith.constant 0 : i32
    return %c0_i32, %c0_i32_0 : i32, i32
  }
  func.func @transform_6(%arg0: i32) -> (i32, i32) {
    %c0_i32 = arith.constant 0 : i32
    %c0_i32_0 = arith.constant 0 : i32
    %c0_i32_1 = arith.constant 0 : i32
    return %c0_i32, %c0_i32_0 : i32, i32
  }
  func.func @transform_7(%arg0: i32) -> (i32, i32) {
    %c0_i32 = arith.constant 0 : i32
    %c0_i32_0 = arith.constant 0 : i32
    %c0_i32_1 = arith.constant 0 : i32
    return %c0_i32, %c0_i32_0 : i32, i32
  }
  func.func @transform_8(%arg0: i32) -> (i32, i32) {
    %c0_i32 = arith.constant 0 : i32
    %c0_i32_0 = arith.constant 0 : i32
    %c0_i32_1 = arith.constant 0 : i32
    return %c0_i32, %c0_i32_0 : i32, i32
  }
  func.func @transform_9(%arg0: i32) -> (i32, i32, i32) {
    %c0_i32 = arith.constant 0 : i32
    %c0_i32_0 = arith.constant 0 : i32
    %c0_i32_1 = arith.constant 0 : i32
    return %arg0, %c0_i32, %c0_i32_0 : i32, i32, i32
  }
}

</mosaic_0001>

<bundles_post_ra>
// kernel: tpu_custom_call.1
= control target key start
LH: loop header
LB: loop body
LE: loop exit
PB: predicated region body
PF: predicated region fallthrough
CT: control target
= control target key end

     0   :  { %14 = vsyncpa [#allocation4], 0  ;;  %s2892_s0 = inlined_call_operand.vmem [shape: f32[2,16,64], index: 0, kind: input, shape index: {}]   ;;  %s2893_s1 = inlined_call_operand.hbm [shape: f32[2,8,32], index: 1, kind: input, shape index: {}]   ;;  %s2894_s2 = inlined_call_operand.vmem [shape: f32[128,64], index: 2, kind: input, shape index: {}]   ;;  %s2895_s3 = inlined_call_operand.vmem [shape: f32[64,64], index: 3, kind: input, shape index: {}]   ;;  %s2896_s4 = inlined_call_operand.vmem [shape: f32[1,64], index: 4, kind: input, shape index: {}]   ;;  %s2897_s5 = inlined_call_operand.vmem [shape: f32[32,64], index: 5, kind: input, shape index: {}]   ;;  %s2898_s6 = inlined_call_operand.vmem [shape: f32[1,64], index: 6, kind: input, shape index: {}]   ;;  %s2899_s7 = inlined_call_operand.vmem [shape: f32[64,64], index: 7, kind: input, shape index: {}]   ;;  %s2900_s8 = inlined_call_operand.vmem [shape: f32[1,64], index: 8, kind: input, shape index: {}]   ;;  %s2901_s9 = inlined_call_operand.hbm [shape: f32[2,16,64], index: 9, kind: output, shape index: {}]  }
   0x1   :  { %15 = vsyncpa [#allocation5], 0  ;;  %s2211_s30 = smov [#allocation3]   ;;  %s2163_s13 = scalar_lea.hbm %s2893_s1, 256 }
   0x2   :  { %s23_s10 = sshll.u32 %s2211_s30, 4  ;;  %p2164_p0 = scmp.ne.s32.totalorder %s2893_s1, %s2163_s13  ;;  %s24_s10 = int_to_ptr.vmem [resolvable:$true] %s23_s10 }
   0x3   :  { %p2167_p1 = scmp.lt.u32.totalorder %s2163_s13, %s2893_s1 }
   0x5   :  { %p2169_p2 = pnand %p2167_p1, %p2164_p0 }
   0x7   :  { %2172 = shalt.err (!%p2169_p2)
}
   0x8   :  { %s2173_s18 = scalar_lea.vmem %s24_s10, 256  ;;  %p2178_p4 = scmp.lt.s32.totalorder %s24_s10, %s24_s10 }
   0x9   :  { %p2174_p3 = scmp.ne.s32.totalorder %s24_s10, %s2173_s18  ;;  %p2179_p5 = scmp.lt.s32.totalorder %s2173_s18, %s2173_s18 }
   0xb   :  { %p2180_p6 = por %p2179_p5, %p2178_p4 }
   0xd   :  { %p2181_p7 = pnand %p2180_p6, %p2174_p3 }
   0xf   :  { %2184 = shalt.err (!%p2181_p7)
}
  0x10   :  { %s2212_s19 = smov 128   ;;  %s2213_s20 = smov 8  }
  0x11   :  { %29 = dma.hbm_to_vmem [thread:$0]  %s2893_s1, 256, %s24_s10, [#allocation4], %s2212_s19, %s2212_s19, %s2213_s20  }
  0x12   :  { %2207 = dma.done.wait [#allocation4], 256  }
  0x13   :  { %2208 = vsyncadd [#allocation4], 4294967040  ;;  %v53_v0 = vld [vmem:[%s2895_s3] sm:$0xff]  ;;  %v54_v1 = vld [vmem:[%s2895_s3 + $0x8] sm:$0xff]  ;;  %vm177_vm0 = vcmask 261120   ;;  %vm68_vm1 = vcmask 523264  }
  0x14   :  { %v166_v2 = vld [vmem:[%s2897_s5] sm:$0xff]  ;;  %v1975_v3 = vpack.c.bf16 %v54_v1, %v53_v0  ;;  %v167_v4 = vld [vmem:[%s2897_s5 + $0x8] sm:$0xff]  ;;  %v55_v5 = vld [vmem:[%s2895_s3 + $0x10] sm:$0xff]  ;;  %vm487_vm2 = vcmask 64512  }
  0x15   :  { %v56_v6 = vld [vmem:[%s2895_s3 + $0x18] sm:$0xff]  ;;  %v1991_v7 = vpack.c.bf16 %v167_v4, %v166_v2  ;;  %v168_v9 = vld [vmem:[%s2897_s5 + $0x10] sm:$0xff]  ;;  %v57_v11 = vld [vmem:[%s2895_s3 + $0x20] sm:$0xff] }
  0x16   :  { %v1979_v8 = vpack.c.bf16 %v56_v6, %v55_v5  ;;  %v169_v10 = vld [vmem:[%s2897_s5 + $0x18] sm:$0xff]  ;;  %1976 = vmatprep.subr.bf16.mxu0 %v1975_v3  ;;  %v58_v13 = vld [vmem:[%s2895_s3 + $0x28] sm:$0xff]  ;;  %v51_v14 = vld [vmem:[#allocation3] sm:$0xff] }
  0x17   :  { %v1995_v12 = vpack.c.bf16 %v169_v10, %v168_v9  ;;  %1978 = vmatpush3.bf16.msra.mxu0 %v1975_v3  ;;  %1992 = vmatprep.subr.bf16.mxu1 %v1991_v7  ;;  %v47_v15 = vld [vmem:[%s2892_s0] sm:$0xff]  ;;  %v1983_v16 = vpack.c.bf16 %v58_v13, %v57_v11  ;;  %v59_v17 = vld [vmem:[%s2895_s3 + $0x30] sm:$0xff]  ;;  %v60_v18 = vld [vmem:[%s2895_s3 + $0x38] sm:$0xff] }
  0x18   :  { %1980 = vmatprep.subr.bf16.mxu0 %v1979_v8  ;;  %1994 = vmatpush3.bf16.msra.mxu1 %v1991_v7  ;;  %v52_v19 = vld [vmem:[#allocation3 + $0x8] sm:$0xff]  ;;  %v1987_v20 = vpack.c.bf16 %v60_v18, %v59_v17  ;;  %v49_v22 = vld [vmem:[%s2892_s0 + $0x10] sm:$0xff]  ;;  %v50_v23 = vld [vmem:[%s2892_s0 + $0x18] sm:$0xff] }
  0x19   :  { %1996 = vmatprep.subr.bf16.mxu1 %v1995_v12  ;;  %1846 = vmatprep.mubr.msk.f32.mxu1 %vm177_vm0, %v51_v14  ;;  %v48_v21 = vld [vmem:[%s2892_s0 + $0x8] sm:$0xff]  ;;  %v1644_v24 = vld [vmem:[%s2898_s6] ss:$0 sm:$0xff]  ;;  %v261_v36 = vld [vmem:[%s2894_s2 + $0x10] sm:$0xff] }
  0x1a   :  { %1832 = vmatprep.mubr.msk.f32.mxu0 %vm68_vm1, %v47_v15  ;;  %v1639_v29 = vld [vmem:[%s2896_s4] ss:$0 sm:$0xff]  ;;  %v260_v35 = vld [vmem:[%s2894_s2 + $0x8] sm:$0xff]  ;;  %v262_v42 = vld [vmem:[%s2894_s2 + $0x18] sm:$0xff]  ;;  %s2214_s4 = smov [#allocation6]  }
  0x1b   :  { %1982 = vmatpush3.bf16.msra.mxu0 %v1979_v8  ;;  %v259_v33 = vld [vmem:[%s2894_s2] sm:$0xff]  ;;  %v264_v46 = vld [vmem:[%s2894_s2 + $0x28] sm:$0xff]  ;;  %v265_v47 = vld [vmem:[%s2894_s2 + $0x30] sm:$0xff]  ;;  %s1627_s17 = sshll.u32 %s2214_s4, 4  ;;  %s1628_s17 = int_to_ptr.vmem [resolvable:$true] %s1627_s17 }
  0x1c   :  { %1984 = vmatprep.subr.bf16.mxu0 %v1983_v16  ;;  %1998 = vmatpush3.bf16.msra.mxu1 %v1995_v12  ;;  %v263_v43 = vld [vmem:[%s2894_s2 + $0x20] sm:$0xff]  ;;  %v266_v50 = vld [vmem:[%s2894_s2 + $0x38] sm:$0xff]  ;;  %v268_v54 = vld [vmem:[%s2894_s2 + $0x48] sm:$0xff]  ;;  %p2190_p9 = scmp.lt.s32.totalorder %s1628_s17, %s1628_s17 }
  0x1d   :  { %v267_v51 = vld [vmem:[%s2894_s2 + $0x40] sm:$0xff]  ;;  %v269_v55 = vld [vmem:[%s2894_s2 + $0x50] sm:$0xff]  ;;  %v270_v58 = vld [vmem:[%s2894_s2 + $0x58] sm:$0xff] }
  0x1e   :  { %v271_v59 = vld [vmem:[%s2894_s2 + $0x60] sm:$0xff]  ;;  %v272_v62 = vld [vmem:[%s2894_s2 + $0x68] sm:$0xff]  ;;  %v273_v63 = vld [vmem:[%s2894_s2 + $0x70] sm:$0xff] }
  0x1f   :  { %1986 = vmatpush3.bf16.msra.mxu0 %v1983_v16  ;;  %1847 = vmatmul.mubr.msk.f32.vlgmr.msra.gmra.mrb[0].mxu1 %vm177_vm0, %v52_v19  ;;  %v274_v3 = vld [vmem:[%s2894_s2 + $0x78] sm:$0xff] }
  0x20   :  { %1988 = vmatprep.subr.bf16.mxu0 %v1987_v20 }
  0x23   :  { %1990 = vmatpush3.bf16.msra.mxu0 %v1987_v20 }
  0x26   :  { %1833 = vmatmul.mubr.msk.f32.vlgmr.msra.gmra.mrb[0].mxu0 %vm68_vm1, %v48_v21 }
  0x27   :  { %1835 = vmatprep.mubr.msk.f32.mxu0 %vm68_vm1, %v49_v22 }
  0x2a   :  { %1836 = vmatmul.mubr.msk.f32.gmra.mrb[2].mxu0 %vm68_vm1, %v50_v23 }
  0xf2   :  { %v1848_v25 = vpop.f32.mrb[0].mxu1 }
  0xf3   :  { %v250_v26 = vpop.f32.mrb[1].mxu1  ;;  %v2337_v27 = vadd.f32 %v1848_v25, %v1644_v24 }
  0xf4   :  { %v251_v28 = vadd.f32 %v1644_v24, %v250_v26 }
  0xf6   :  { %1849 = vmatprep.subr.msk.mxu1 %vm68_vm1, %v251_v28  ;;  %1875 = vmatprep.subr.mxu0 %v251_v28 }
  0xf7   :  { %1850 = vmatpush3.xpose.msk.msra.mxu1 %vm68_vm1, %v251_v28  ;;  %1876 = vmatpush3.msra.mxu0 %v251_v28 }
  0xf8   :  { %1901 = vmatprep.subr.msk.mxu1 %vm68_vm1, %v2337_v27  ;;  %1927 = vmatprep.subr.mxu0 %v2337_v27 }
  0xf9   :  { %v1834_v30 = vpop.f32.mrb[0].mxu0 }
  0xfa   :  { %v153_v31 = vadd.f32 %v1834_v30, %v1639_v29  ;;  %v147_v32 = vpop.f32.mrb[1].mxu0 }
  0xfb   :  { %v148_v34 = vadd.f32 %v1639_v29, %v147_v32 }
  0xfc   :  { %v276_v39 = vmul.f32 %v260_v35, %v153_v31  ;;  %v278_v44 = vmul.f32 %v262_v42, %v153_v31  ;;  %v280_v48 = vmul.f32 %v264_v46, %v153_v31  ;;  %v282_v52 = vmul.f32 %v266_v50, %v153_v31 }
  0xfd   :  { %v275_v37 = vmul.f32 %v259_v33, %v148_v34  ;;  %v1837_v38 = vpop.f32.mrb[2].mxu0  ;;  %v277_v41 = vmul.f32 %v261_v36, %v148_v34  ;;  %v279_v45 = vmul.f32 %v263_v43, %v148_v34  ;;  %v281_v49 = vmul.f32 %v265_v47, %v148_v34 }
  0xfe   :  { %v157_v40 = vpop.f32.mrb[3].mxu0  ;;  %v283_v53 = vmul.f32 %v267_v51, %v148_v34  ;;  %v284_v56 = vmul.f32 %v268_v54, %v153_v31  ;;  %v285_v57 = vmul.f32 %v269_v55, %v148_v34  ;;  %v286_v60 = vmul.f32 %v270_v58, %v153_v31 }
  0xff   :  { %1851 = vmatprep.mubr.msk.f32.mxu1 %vm68_vm1, %v275_v37  ;;  %v287_v61 = vmul.f32 %v271_v59, %v148_v34  ;;  %v158_v0 = vadd.f32 %v1639_v29, %v157_v40  ;;  %v288_v1 = vmul.f32 %v272_v62, %v153_v31  ;;  %v289_v2 = vmul.f32 %v273_v63, %v148_v34 }
 0x100   :  { %1852 = vmatmul.mubr.msk.f32.vlgmr.msra.gmra.mrb[2].mxu1 %vm68_vm1, %v276_v39  ;;  %v163_v4 = vadd.f32 %v1837_v38, %v1639_v29  ;;  %v290_v6 = vmul.f32 %v274_v3, %v153_v31 }
 0x101   :  { %1902 = vmatpush3.xpose.msk.msra.mxu1 %vm68_vm1, %v2337_v27  ;;  %1854 = vmatprep.mubr.msk.f32.mxu1 %vm68_vm1, %v277_v41  ;;  %v889_v5 = vmul.f32 %v259_v33, %v158_v0  ;;  %v891_v8 = vmul.f32 %v261_v36, %v158_v0  ;;  %v893_v10 = vmul.f32 %v263_v43, %v158_v0 }
 0x102   :  { %v890_v7 = vmul.f32 %v260_v35, %v163_v4  ;;  %v892_v9 = vmul.f32 %v262_v42, %v163_v4  ;;  %v894_v11 = vmul.f32 %v264_v46, %v163_v4  ;;  %v895_v12 = vmul.f32 %v265_v47, %v158_v0 }
 0x103   :  { %v896_v13 = vmul.f32 %v266_v50, %v163_v4  ;;  %v897_v14 = vmul.f32 %v267_v51, %v158_v0  ;;  %v898_v15 = vmul.f32 %v268_v54, %v163_v4  ;;  %v899_v16 = vmul.f32 %v269_v55, %v158_v0 }
 0x104   :  { %1855 = vmatmul.mubr.msk.f32.gmra.mrb[4].mxu1 %vm68_vm1, %v278_v44  ;;  %v900_v17 = vmul.f32 %v270_v58, %v163_v4  ;;  %v901_v18 = vmul.f32 %v271_v59, %v158_v0  ;;  %v902_v19 = vmul.f32 %v272_v62, %v163_v4  ;;  %v903_v20 = vmul.f32 %v273_v63, %v158_v0 }
 0x105   :  { %1857 = vmatprep.mubr.msk.f32.mxu1 %vm68_vm1, %v279_v45  ;;  %v904_v21 = vmul.f32 %v274_v3, %v163_v4 }
 0x108   :  { %1858 = vmatmul.mubr.msk.f32.gmra.mrb[6].mxu1 %vm68_vm1, %v280_v48 }
 0x109   :  { %1860 = vmatprep.mubr.msk.f32.mxu1 %vm68_vm1, %v281_v49 }
 0x10c   :  { %1861 = vmatmul.mubr.msk.f32.gmra.mrb[8].mxu1 %vm68_vm1, %v282_v52 }
 0x10d   :  { %1863 = vmatprep.mubr.msk.f32.mxu1 %vm68_vm1, %v283_v53 }
 0x110   :  { %1864 = vmatmul.mubr.msk.f32.gmra.mrb[10].mxu1 %vm68_vm1, %v284_v56 }
 0x111   :  { %1866 = vmatprep.mubr.msk.f32.mxu1 %vm68_vm1, %v285_v57 }
 0x114   :  { %1867 = vmatmul.mubr.msk.f32.gmra.mrb[12].mxu1 %vm68_vm1, %v286_v60 }
 0x115   :  { %1869 = vmatprep.mubr.msk.f32.mxu1 %vm68_vm1, %v287_v61 }
 0x118   :  { %1870 = vmatmul.mubr.msk.f32.gmra.mrb[14].mxu1 %vm68_vm1, %v288_v1 }
 0x119   :  { %1872 = vmatprep.mubr.msk.f32.mxu1 %vm68_vm1, %v289_v2 }
 0x11c   :  { %1873 = vmatmul.mubr.msk.f32.gmra.mrb[16].mxu1 %vm68_vm1, %v290_v6 }
 0x11d   :  { %1903 = vmatprep.mubr.msk.f32.mxu1 %vm68_vm1, %v889_v5 }
 0x120   :  { %1904 = vmatmul.mubr.msk.f32.vlgmr.msra.gmra.mrb[18].mxu1 %vm68_vm1, %v890_v7 }
 0x121   :  { %1906 = vmatprep.mubr.msk.f32.mxu1 %vm68_vm1, %v891_v8 }
 0x124   :  { %1907 = vmatmul.mubr.msk.f32.gmra.mrb[20].mxu1 %vm68_vm1, %v892_v9 }
 0x125   :  { %1909 = vmatprep.mubr.msk.f32.mxu1 %vm68_vm1, %v893_v10 }
 0x128   :  { %1910 = vmatmul.mubr.msk.f32.gmra.mrb[22].mxu1 %vm68_vm1, %v894_v11 }
 0x129   :  { %1912 = vmatprep.mubr.msk.f32.mxu1 %vm68_vm1, %v895_v12 }
 0x12c   :  { %1913 = vmatmul.mubr.msk.f32.gmra.mrb[24].mxu1 %vm68_vm1, %v896_v13 }
 0x12d   :  { %1915 = vmatprep.mubr.msk.f32.mxu1 %vm68_vm1, %v897_v14 }
 0x130   :  { %1916 = vmatmul.mubr.msk.f32.gmra.mrb[26].mxu1 %vm68_vm1, %v898_v15 }
 0x131   :  { %1918 = vmatprep.mubr.msk.f32.mxu1 %vm68_vm1, %v899_v16 }
 0x134   :  { %1919 = vmatmul.mubr.msk.f32.gmra.mrb[28].mxu1 %vm68_vm1, %v900_v17 }
 0x135   :  { %1921 = vmatprep.mubr.msk.f32.mxu1 %vm68_vm1, %v901_v18 }
 0x138   :  { %1922 = vmatmul.mubr.msk.f32.gmra.mrb[30].mxu1 %vm68_vm1, %v902_v19 }
 0x139   :  { %1924 = vmatprep.mubr.msk.f32.mxu1 %vm68_vm1, %v903_v20 }
 0x13c   :  { %1925 = vmatmul.mubr.msk.f32.gmra.mrb[32].mxu1 %vm68_vm1, %v904_v21 }
 0x1d3   :  { %v2429_v22 = vpop.f32.mrb[2].mxu1 }
 0x1d4   :  { %v2431_v23 = vpop.f32.mrb[3].mxu1  ;;  %v491_v28 = vsel %vm487_vm2, %v2429_v22, -inf }
 0x1d5   :  { %v488_v24 = vsel %vm487_vm2, %v2431_v23, -inf }
 0x1d6   :  { %489 = vmax.xlane.f32.xlu0 %v488_v24 }
 0x1d7   :  { %v2435_v25 = vpop.f32.mrb[4].mxu1 }
 0x1d8   :  { %v2437_v26 = vpop.f32.mrb[5].mxu1  ;;  %v497_v32 = vsel %vm487_vm2, %v2435_v25, -inf }
 0x1d9   :  { %v494_v29 = vsel %vm487_vm2, %v2437_v26, -inf }
 0x1da   :  { %492 = vmax.xlane.f32.xlu0 %v491_v28  ;;  %495 = vmax.xlane.f32.xlu1 %v494_v29 }
 0x1db   :  { %v2443_v30 = vpop.f32.mrb[6].mxu1 }
 0x1dc   :  { %v2445_v31 = vpop.f32.mrb[7].mxu1  ;;  %v503_v36 = vsel %vm487_vm2, %v2443_v30, -inf }
 0x1dd   :  { %v500_v33 = vsel %vm487_vm2, %v2445_v31, -inf }
 0x1de   :  { %498 = vmax.xlane.f32.xlu1 %v497_v32  ;;  %501 = vmax.xlane.f32.xlu0 %v500_v33 }
 0x1df   :  { %v2451_v34 = vpop.f32.mrb[8].mxu1 }
 0x1e0   :  { %v2453_v35 = vpop.f32.mrb[9].mxu1  ;;  %v509_v40 = vsel %vm487_vm2, %v2451_v34, -inf }
 0x1e1   :  { %v506_v37 = vsel %vm487_vm2, %v2453_v35, -inf }
 0x1e2   :  { %504 = vmax.xlane.f32.xlu1 %v503_v36  ;;  %507 = vmax.xlane.f32.xlu0 %v506_v37 }
 0x1e3   :  { %v2459_v38 = vpop.f32.mrb[10].mxu1 }
 0x1e4   :  { %v2461_v39 = vpop.f32.mrb[11].mxu1  ;;  %v515_v44 = vsel %vm487_vm2, %v2459_v38, -inf }
 0x1e5   :  { %v512_v41 = vsel %vm487_vm2, %v2461_v39, -inf }
 0x1e6   :  { %510 = vmax.xlane.f32.xlu1 %v509_v40  ;;  %513 = vmax.xlane.f32.xlu0 %v512_v41 }
 0x1e7   :  { %v2467_v42 = vpop.f32.mrb[12].mxu1 }
 0x1e8   :  { %v2469_v43 = vpop.f32.mrb[13].mxu1  ;;  %v521_v48 = vsel %vm487_vm2, %v2467_v42, -inf }
 0x1e9   :  { %v518_v45 = vsel %vm487_vm2, %v2469_v43, -inf }
 0x1ea   :  { %516 = vmax.xlane.f32.xlu1 %v515_v44  ;;  %519 = vmax.xlane.f32.xlu0 %v518_v45 }
 0x1eb   :  { %v2475_v46 = vpop.f32.mrb[14].mxu1 }
 0x1ec   :  { %v2477_v47 = vpop.f32.mrb[15].mxu1  ;;  %v527_v52 = vsel %vm487_vm2, %v2475_v46, -inf }
 0x1ed   :  { %v524_v49 = vsel %vm487_vm2, %v2477_v47, -inf }
 0x1ee   :  { %522 = vmax.xlane.f32.xlu1 %v521_v48  ;;  %525 = vmax.xlane.f32.xlu0 %v524_v49 }
 0x1ef   :  { %v2483_v50 = vpop.f32.mrb[16].mxu1 }
 0x1f0   :  { %v2485_v51 = vpop.f32.mrb[17].mxu1  ;;  %v533_v56 = vsel %vm487_vm2, %v2483_v50, -inf }
 0x1f1   :  { %v530_v53 = vsel %vm487_vm2, %v2485_v51, -inf }
 0x1f2   :  { %528 = vmax.xlane.f32.xlu1 %v527_v52  ;;  %531 = vmax.xlane.f32.xlu0 %v530_v53 }
 0x1f3   :  { %v2491_v54 = vpop.f32.mrb[18].mxu1 }
 0x1f4   :  { %v2493_v55 = vpop.f32.mrb[19].mxu1  ;;  %v1104_v60 = vsel %vm487_vm2, %v2491_v54, -inf }
 0x1f5   :  { %v1101_v57 = vsel %vm487_vm2, %v2493_v55, -inf }
 0x1f6   :  { %534 = vmax.xlane.f32.xlu1 %v533_v56  ;;  %1102 = vmax.xlane.f32.xlu0 %v1101_v57 }
 0x1f7   :  { %v2499_v58 = vpop.f32.mrb[20].mxu1 }
 0x1f8   :  { %v2501_v59 = vpop.f32.mrb[21].mxu1  ;;  %v1110_v0 = vsel %vm487_vm2, %v2499_v58, -inf }
 0x1f9   :  { %v1107_v61 = vsel %vm487_vm2, %v2501_v59, -inf }
 0x1fa   :  { %1105 = vmax.xlane.f32.xlu1 %v1104_v60  ;;  %1108 = vmax.xlane.f32.xlu0 %v1107_v61 }
 0x1fb   :  { %v2507_v62 = vpop.f32.mrb[22].mxu1 }
 0x1fc   :  { %v2509_v63 = vpop.f32.mrb[23].mxu1  ;;  %v1116_v4 = vsel %vm487_vm2, %v2507_v62, -inf }
 0x1fd   :  { %v1113_v1 = vsel %vm487_vm2, %v2509_v63, -inf }
 0x1fe   :  { %1111 = vmax.xlane.f32.xlu1 %v1110_v0  ;;  %1114 = vmax.xlane.f32.xlu0 %v1113_v1 }
 0x1ff   :  { %v2515_v2 = vpop.f32.mrb[24].mxu1 }
 0x200   :  { %v2517_v3 = vpop.f32.mrb[25].mxu1  ;;  %v1122_v8 = vsel %vm487_vm2, %v2515_v2, -inf }
 0x201   :  { %v1119_v5 = vsel %vm487_vm2, %v2517_v3, -inf }
 0x202   :  { %1117 = vmax.xlane.f32.xlu1 %v1116_v4  ;;  %1120 = vmax.xlane.f32.xlu0 %v1119_v5 }
 0x203   :  { %v2523_v6 = vpop.f32.mrb[26].mxu1 }
 0x204   :  { %v2525_v7 = vpop.f32.mrb[27].mxu1  ;;  %v1128_v12 = vsel %vm487_vm2, %v2523_v6, -inf }
 0x205   :  { %v1125_v9 = vsel %vm487_vm2, %v2525_v7, -inf }
 0x206   :  { %1123 = vmax.xlane.f32.xlu1 %v1122_v8  ;;  %1126 = vmax.xlane.f32.xlu0 %v1125_v9 }
 0x207   :  { %v2531_v10 = vpop.f32.mrb[28].mxu1 }
 0x208   :  { %v2533_v11 = vpop.f32.mrb[29].mxu1  ;;  %v1134_v16 = vsel %vm487_vm2, %v2531_v10, -inf }
 0x209   :  { %v1131_v13 = vsel %vm487_vm2, %v2533_v11, -inf }
 0x20a   :  { %1129 = vmax.xlane.f32.xlu1 %v1128_v12  ;;  %1132 = vmax.xlane.f32.xlu0 %v1131_v13 }
 0x20b   :  { %v2539_v14 = vpop.f32.mrb[30].mxu1 }
 0x20c   :  { %v2541_v15 = vpop.f32.mrb[31].mxu1  ;;  %v1140_v20 = vsel %vm487_vm2, %v2539_v14, -inf }
 0x20d   :  { %v1137_v17 = vsel %vm487_vm2, %v2541_v15, -inf }
 0x20e   :  { %1135 = vmax.xlane.f32.xlu1 %v1134_v16  ;;  %1138 = vmax.xlane.f32.xlu0 %v1137_v17 }
 0x20f   :  { %v2547_v18 = vpop.f32.mrb[32].mxu1 }
 0x210   :  { %v2549_v19 = vpop.f32.mrb[33].mxu1  ;;  %v1146_v24 = vsel %vm487_vm2, %v2547_v18, -inf }
 0x211   :  { %v1143_v21 = vsel %vm487_vm2, %v2549_v19, -inf }
 0x212   :  { %1141 = vmax.xlane.f32.xlu1 %v1140_v20  ;;  %1144 = vmax.xlane.f32.xlu0 %v1143_v21 }
 0x216   :  { %1147 = vmax.xlane.f32.xlu1 %v1146_v24 }
 0x263   :  { %v490_v28 = vpop.xlane.xlu0 %489 }
 0x264   :  { %v536_v29 = vsub.f32 %v2431_v23, %v490_v28 }
 0x266   :  { %v552_v32 = vmul.f32 1.442695, %v536_v29 }
 0x267   :  { %v493_v33 = vpop.xlane.xlu0 %492  ;;  %v496_v36 = vpop.xlane.xlu1 %495 }
 0x268   :  { %2019 = vpow2.f32 %v552_v32  ;;  %v537_v37 = vsub.f32 %v2429_v22, %v493_v33  ;;  %v538_v40 = vsub.f32 %v2437_v26, %v496_v36 }
 0x26a   :  { %v554_v41 = vmul.f32 1.442695, %v537_v37  ;;  %v556_v44 = vmul.f32 1.442695, %v538_v40 }
 0x26b   :  { %v499_v45 = vpop.xlane.xlu1 %498  ;;  %v502_v48 = vpop.xlane.xlu0 %501 }
 0x26c   :  { %2021 = vpow2.f32 %v554_v41  ;;  %v539_v49 = vsub.f32 %v2435_v25, %v499_v45  ;;  %v540_v52 = vsub.f32 %v2445_v31, %v502_v48 }
 0x26d   :  { %2023 = vpow2.f32 %v556_v44 }
 0x26e   :  { %v558_v53 = vmul.f32 1.442695, %v539_v49  ;;  %v560_v23 = vmul.f32 1.442695, %v540_v52 }
 0x26f   :  { %v505_v56 = vpop.xlane.xlu1 %504  ;;  %v508_v57 = vpop.xlane.xlu0 %507 }
 0x270   :  { %2025 = vpow2.f32 %v558_v53  ;;  %v541_v60 = vsub.f32 %v2443_v30, %v505_v56  ;;  %v542_v22 = vsub.f32 %v2453_v35, %v508_v57 }
 0x271   :  { %2027 = vpow2.f32 %v560_v23 }
 0x272   :  { %v2564_v26 = vpop.eup %2019  ;;  %v562_v61 = vmul.f32 1.442695, %v541_v60  ;;  %v564_v0 = vmul.f32 1.442695, %v542_v22 }
 0x273   :  { %v511_v1 = vpop.xlane.xlu1 %510  ;;  %v514_v4 = vpop.xlane.xlu0 %513  ;;  %v584_v25 = vsel %vm487_vm2, %v2564_v26, 0.0 }
 0x274   :  { %2029 = vpow2.f32 %v562_v61  ;;  %v543_v31 = vsub.f32 %v2451_v34, %v511_v1  ;;  %v544_v5 = vsub.f32 %v2461_v39, %v514_v4  ;;  %585 = vadd.xlane.f32.xlu0 %v584_v25 }
 0x275   :  { %2031 = vpow2.f32 %v564_v0 }
 0x276   :  { %v2570_v30 = vpop.eup %2021  ;;  %v566_v35 = vmul.f32 1.442695, %v543_v31  ;;  %v568_v8 = vmul.f32 1.442695, %v544_v5 }
 0x277   :  { %v2572_v9 = vpop.eup %2023  ;;  %v517_v12 = vpop.xlane.xlu1 %516  ;;  %v587_v16 = vsel %vm487_vm2, %v2570_v30, 0.0 }
 0x278   :  { %v520_v13 = vpop.xlane.xlu0 %519  ;;  %2033 = vpow2.f32 %v566_v35  ;;  %v545_v17 = vsub.f32 %v2459_v38, %v517_v12  ;;  %588 = vadd.xlane.f32.xlu1 %v587_v16  ;;  %v590_v39 = vsel %vm487_vm2, %v2572_v9, 0.0 }
 0x279   :  { %v546_v34 = vsub.f32 %v2469_v43, %v520_v13  ;;  %2035 = vpow2.f32 %v568_v8  ;;  %591 = vadd.xlane.f32.xlu0 %v590_v39 }
 0x27a   :  { %v2580_v20 = vpop.eup %2025  ;;  %v570_v21 = vmul.f32 1.442695, %v545_v17 }
 0x27b   :  { %v572_v24 = vmul.f32 1.442695, %v546_v34  ;;  %v2582_v28 = vpop.eup %2027  ;;  %v523_v29 = vpop.xlane.xlu1 %522  ;;  %v593_v33 = vsel %vm487_vm2, %v2580_v20, 0.0 }
 0x27c   :  { %v526_v32 = vpop.xlane.xlu0 %525  ;;  %2037 = vpow2.f32 %v570_v21  ;;  %v547_v38 = vsub.f32 %v2467_v42, %v523_v29  ;;  %594 = vadd.xlane.f32.xlu1 %v593_v33  ;;  %v596_v36 = vsel %vm487_vm2, %v2582_v28, 0.0 }
 0x27d   :  { %v548_v43 = vsub.f32 %v2477_v47, %v526_v32  ;;  %2039 = vpow2.f32 %v572_v24  ;;  %597 = vadd.xlane.f32.xlu0 %v596_v36 }
 0x27e   :  { %v2590_v37 = vpop.eup %2029  ;;  %v574_v40 = vmul.f32 1.442695, %v547_v38 }
 0x27f   :  { %v576_v41 = vmul.f32 1.442695, %v548_v43  ;;  %v2592_v44 = vpop.eup %2031  ;;  %v529_v45 = vpop.xlane.xlu1 %528  ;;  %v599_v49 = vsel %vm487_vm2, %v2590_v37, 0.0 }
 0x280   :  { %v532_v48 = vpop.xlane.xlu0 %531  ;;  %2041 = vpow2.f32 %v574_v40  ;;  %v549_v42 = vsub.f32 %v2475_v46, %v529_v45  ;;  %600 = vadd.xlane.f32.xlu1 %v599_v49  ;;  %v602_v52 = vsel %vm487_vm2, %v2592_v44, 0.0 }
 0x281   :  { %v550_v47 = vsub.f32 %v2485_v51, %v532_v48  ;;  %2043 = vpow2.f32 %v576_v41  ;;  %603 = vadd.xlane.f32.xlu0 %v602_v52 }
 0x282   :  { %v2600_v53 = vpop.eup %2033  ;;  %v578_v23 = vmul.f32 1.442695, %v549_v42 }
 0x283   :  { %v580_v56 = vmul.f32 1.442695, %v550_v47  ;;  %v2602_v57 = vpop.eup %2035  ;;  %v535_v60 = vpop.xlane.xlu1 %534  ;;  %v605_v61 = vsel %vm487_vm2, %v2600_v53, 0.0 }
 0x284   :  { %v1103_v22 = vpop.xlane.xlu0 %1102  ;;  %2045 = vpow2.f32 %v578_v23  ;;  %v551_v46 = vsub.f32 %v2483_v50, %v535_v60  ;;  %606 = vadd.xlane.f32.xlu1 %v605_v61  ;;  %v608_v0 = vsel %vm487_vm2, %v2602_v57, 0.0 }
 0x285   :  { %v1149_v51 = vsub.f32 %v2493_v55, %v1103_v22  ;;  %2047 = vpow2.f32 %v580_v56  ;;  %609 = vadd.xlane.f32.xlu0 %v608_v0 }
 0x286   :  { %v2610_v1 = vpop.eup %2037  ;;  %v582_v4 = vmul.f32 1.442695, %v551_v46 }
 0x287   :  { %v1165_v25 = vmul.f32 1.442695, %v1149_v51  ;;  %v2612_v31 = vpop.eup %2039  ;;  %v1106_v5 = vpop.xlane.xlu1 %1105  ;;  %v611_v8 = vsel %vm487_vm2, %v2610_v1, 0.0 }
 0x288   :  { %v1109_v35 = vpop.xlane.xlu0 %1108  ;;  %2049 = vpow2.f32 %v582_v4  ;;  %v1150_v50 = vsub.f32 %v2491_v54, %v1106_v5  ;;  %612 = vadd.xlane.f32.xlu1 %v611_v8  ;;  %v614_v12 = vsel %vm487_vm2, %v2612_v31, 0.0 }
 0x289   :  { %v1151_v55 = vsub.f32 %v2501_v59, %v1109_v35  ;;  %2051 = vpow2.f32 %v1165_v25  ;;  %615 = vadd.xlane.f32.xlu0 %v614_v12 }
 0x28a   :  { %v2620_v13 = vpop.eup %2041  ;;  %v1167_v16 = vmul.f32 1.442695, %v1150_v50 }
 0x28b   :  { %v1169_v17 = vmul.f32 1.442695, %v1151_v55  ;;  %v2622_v34 = vpop.eup %2043  ;;  %v1112_v39 = vpop.xlane.xlu1 %1111  ;;  %v617_v24 = vsel %vm487_vm2, %v2620_v13, 0.0 }
 0x28c   :  { %v1115_v21 = vpop.xlane.xlu0 %1114  ;;  %2053 = vpow2.f32 %v1167_v16  ;;  %v1152_v54 = vsub.f32 %v2499_v58, %v1112_v39  ;;  %618 = vadd.xlane.f32.xlu1 %v617_v24  ;;  %v620_v29 = vsel %vm487_vm2, %v2622_v34, 0.0 }
 0x28d   :  { %v1153_v59 = vsub.f32 %v2509_v63, %v1115_v21  ;;  %2055 = vpow2.f32 %v1169_v17  ;;  %621 = vadd.xlane.f32.xlu0 %v620_v29 }
 0x28e   :  { %v2630_v32 = vpop.eup %2045  ;;  %v1171_v33 = vmul.f32 1.442695, %v1152_v54 }
 0x28f   :  { %v1173_v38 = vmul.f32 1.442695, %v1153_v59  ;;  %v2632_v43 = vpop.eup %2047  ;;  %v1118_v36 = vpop.xlane.xlu1 %1117  ;;  %v623_v41 = vsel %vm487_vm2, %v2630_v32, 0.0 }
 0x290   :  { %v1121_v40 = vpop.xlane.xlu0 %1120  ;;  %2057 = vpow2.f32 %v1171_v33  ;;  %v1154_v58 = vsub.f32 %v2507_v62, %v1118_v36  ;;  %624 = vadd.xlane.f32.xlu1 %v623_v41  ;;  %v626_v45 = vsel %vm487_vm2, %v2632_v43, 0.0 }
 0x291   :  { %v1155_v63 = vsub.f32 %v2517_v3, %v1121_v40  ;;  %2059 = vpow2.f32 %v1173_v38  ;;  %627 = vadd.xlane.f32.xlu0 %v626_v45 }
 0x292   :  { %v2640_v48 = vpop.eup %2049  ;;  %v1175_v49 = vmul.f32 1.442695, %v1154_v58 }
 0x293   :  { %v1177_v42 = vmul.f32 1.442695, %v1155_v63  ;;  %v2642_v47 = vpop.eup %2051  ;;  %v1124_v52 = vpop.xlane.xlu1 %1123  ;;  %v629_v56 = vsel %vm487_vm2, %v2640_v48, 0.0 }
 0x294   :  { %v1127_v23 = vpop.xlane.xlu0 %1126  ;;  %2061 = vpow2.f32 %v1175_v49  ;;  %v1156_v62 = vsub.f32 %v2515_v2, %v1124_v52  ;;  %630 = vadd.xlane.f32.xlu1 %v629_v56  ;;  %v1197_v60 = vsel %vm487_vm2, %v2642_v47, 0.0 }
 0x295   :  { %v1157_v3 = vsub.f32 %v2525_v7, %v1127_v23  ;;  %2063 = vpow2.f32 %v1177_v42  ;;  %1198 = vadd.xlane.f32.xlu0 %v1197_v60 }
 0x296   :  { %v2650_v22 = vpop.eup %2053  ;;  %v1179_v61 = vmul.f32 1.442695, %v1156_v62 }
 0x297   :  { %v1181_v46 = vmul.f32 1.442695, %v1157_v3  ;;  %v2652_v51 = vpop.eup %2055  ;;  %v1130_v0 = vpop.xlane.xlu1 %1129  ;;  %v1200_v25 = vsel %vm487_vm2, %v2650_v22, 0.0 }
 0x298   :  { %v1133_v4 = vpop.xlane.xlu0 %1132  ;;  %2065 = vpow2.f32 %v1179_v61  ;;  %v1158_v2 = vsub.f32 %v2523_v6, %v1130_v0  ;;  %1201 = vadd.xlane.f32.xlu1 %v1200_v25  ;;  %v1203_v5 = vsel %vm487_vm2, %v2652_v51, 0.0 }
 0x299   :  { %v1159_v7 = vsub.f32 %v2533_v11, %v1133_v4  ;;  %2067 = vpow2.f32 %v1181_v46  ;;  %1204 = vadd.xlane.f32.xlu0 %v1203_v5 }
 0x29a   :  { %v2660_v35 = vpop.eup %2057  ;;  %v1183_v8 = vmul.f32 1.442695, %v1158_v2 }
 0x29b   :  { %v1185_v50 = vmul.f32 1.442695, %v1159_v7  ;;  %v2662_v55 = vpop.eup %2059  ;;  %v1136_v12 = vpop.xlane.xlu1 %1135  ;;  %v1206_v17 = vsel %vm487_vm2, %v2660_v35, 0.0 }
 0x29c   :  { %v1139_v16 = vpop.xlane.xlu0 %1138  ;;  %2069 = vpow2.f32 %v1183_v8  ;;  %v1160_v6 = vsub.f32 %v2531_v10, %v1136_v12  ;;  %1207 = vadd.xlane.f32.xlu1 %v1206_v17  ;;  %v1209_v39 = vsel %vm487_vm2, %v2662_v55, 0.0 }
 0x29d   :  { %v1161_v11 = vsub.f32 %v2541_v15, %v1139_v16  ;;  %2071 = vpow2.f32 %v1185_v50  ;;  %1210 = vadd.xlane.f32.xlu0 %v1209_v39 }
 0x29e   :  { %v2670_v21 = vpop.eup %2061  ;;  %v1187_v24 = vmul.f32 1.442695, %v1160_v6 }
 0x29f   :  { %v1189_v54 = vmul.f32 1.442695, %v1161_v11  ;;  %v2672_v59 = vpop.eup %2063  ;;  %v1142_v29 = vpop.xlane.xlu1 %1141  ;;  %v1212_v38 = vsel %vm487_vm2, %v2670_v21, 0.0 }
 0x2a0   :  { %v1145_v33 = vpop.xlane.xlu0 %1144  ;;  %2073 = vpow2.f32 %v1187_v24  ;;  %v1162_v10 = vsub.f32 %v2539_v14, %v1142_v29  ;;  %1213 = vadd.xlane.f32.xlu1 %v1212_v38  ;;  %v1215_v36 = vsel %vm487_vm2, %v2672_v59, 0.0 }
 0x2a1   :  { %v1163_v15 = vsub.f32 %v2549_v19, %v1145_v33  ;;  %2075 = vpow2.f32 %v1189_v54  ;;  %1216 = vadd.xlane.f32.xlu0 %v1215_v36 }
 0x2a2   :  { %v2680_v40 = vpop.eup %2065  ;;  %v1191_v41 = vmul.f32 1.442695, %v1162_v10 }
 0x2a3   :  { %v1193_v58 = vmul.f32 1.442695, %v1163_v15  ;;  %v2682_v63 = vpop.eup %2067  ;;  %v1148_v45 = vpop.xlane.xlu1 %1147  ;;  %v1218_v49 = vsel %vm487_vm2, %v2680_v40, 0.0 }
 0x2a4   :  { %2077 = vpow2.f32 %v1191_v41  ;;  %v1164_v14 = vsub.f32 %v2547_v18, %v1148_v45  ;;  %1219 = vadd.xlane.f32.xlu1 %v1218_v49  ;;  %v1221_v19 = vsel %vm487_vm2, %v2682_v63, 0.0 }
 0x2a5   :  { %2079 = vpow2.f32 %v1193_v58  ;;  %1222 = vadd.xlane.f32.xlu0 %v1221_v19 }
 0x2a6   :  { %v2689_v42 = vpop.eup %2069  ;;  %v1195_v52 = vmul.f32 1.442695, %v1164_v14 }
 0x2a7   :  { %v2691_v23 = vpop.eup %2071  ;;  %v1224_v56 = vsel %vm487_vm2, %v2689_v42, 0.0 }
 0x2a8   :  { %2081 = vpow2.f32 %v1195_v52  ;;  %1225 = vadd.xlane.f32.xlu1 %v1224_v56  ;;  %v1227_v62 = vsel %vm487_vm2, %v2691_v23, 0.0 }
 0x2a9   :  { %1228 = vadd.xlane.f32.xlu0 %v1227_v62 }
 0x2aa   :  { %v2697_v18 = vpop.eup %2073 }
 0x2ab   :  { %v2699_v3 = vpop.eup %2075  ;;  %v1230_v60 = vsel %vm487_vm2, %v2697_v18, 0.0 }
 0x2ac   :  { %1231 = vadd.xlane.f32.xlu1 %v1230_v60  ;;  %v1233_v61 = vsel %vm487_vm2, %v2699_v3, 0.0 }
 0x2ad   :  { %1234 = vadd.xlane.f32.xlu0 %v1233_v61 }
 0x2ae   :  { %v2705_v46 = vpop.eup %2077 }
 0x2af   :  { %v2707_v0 = vpop.eup %2079  ;;  %v1236_v4 = vsel %vm487_vm2, %v2705_v46, 0.0 }
 0x2b0   :  { %1237 = vadd.xlane.f32.xlu1 %v1236_v4  ;;  %v1239_v25 = vsel %vm487_vm2, %v2707_v0, 0.0 }
 0x2b1   :  { %1240 = vadd.xlane.f32.xlu0 %v1239_v25 }
 0x2b2   :  { %v2713_v2 = vpop.eup %2081 }
 0x2b3   :  { %v1242_v7 = vsel %vm487_vm2, %v2713_v2, 0.0 }
 0x2b4   :  { %1243 = vadd.xlane.f32.xlu1 %v1242_v7 }
 0x301   :  { %v586_v5 = vpop.xlane.xlu0 %585 }
 0x302   :  { %2083 = vrcp.f32 %v586_v5 }
 0x305   :  { %v589_v8 = vpop.xlane.xlu1 %588 }
 0x306   :  { %2085 = vrcp.f32 %v589_v8  ;;  %v592_v50 = vpop.xlane.xlu0 %591 }
 0x307   :  { %2087 = vrcp.f32 %v592_v50 }
 0x309   :  { %v595_v12 = vpop.xlane.xlu1 %594 }
 0x30a   :  { %2089 = vrcp.f32 %v595_v12  ;;  %v598_v16 = vpop.xlane.xlu0 %597 }
 0x30b   :  { %2091 = vrcp.f32 %v598_v16 }
 0x30c   :  { %v2084_v17 = vpop.eup %2083 }
 0x30d   :  { %v601_v6 = vpop.xlane.xlu1 %600  ;;  %v633_v11 = vmul.f32 %v2084_v17, %v2564_v26 }
 0x30e   :  { %2093 = vrcp.f32 %v601_v6  ;;  %v604_v39 = vpop.xlane.xlu0 %603 }
 0x30f   :  { %2095 = vrcp.f32 %v604_v39  ;;  %1877 = vmatprep.mubr.msk.f32.mxu0 %vm487_vm2, %v633_v11 }
 0x310   :  { %v2086_v24 = vpop.eup %2085 }
 0x311   :  { %v2088_v54 = vpop.eup %2087  ;;  %v635_v29 = vmul.f32 %v2086_v24, %v2570_v30  ;;  %v607_v33 = vpop.xlane.xlu1 %606 }
 0x312   :  { %2097 = vrcp.f32 %v607_v33  ;;  %v610_v38 = vpop.xlane.xlu0 %609  ;;  %v637_v10 = vmul.f32 %v2088_v54, %v2572_v9 }
 0x313   :  { %2099 = vrcp.f32 %v610_v38  ;;  %1878 = vmatmul.mubr.msk.f32.vlgmr.msra.gmra.mrb[4].mxu0 %vm487_vm2, %v635_v29 }
 0x314   :  { %v2090_v15 = vpop.eup %2089  ;;  %1928 = vmatpush3.msra.mxu0 %v2337_v27  ;;  %1880 = vmatprep.mubr.msk.f32.mxu0 %vm487_vm2, %v637_v10 }
 0x315   :  { %v2092_v26 = vpop.eup %2091  ;;  %v613_v36 = vpop.xlane.xlu1 %612  ;;  %v639_v41 = vmul.f32 %v2090_v15, %v2580_v20 }
 0x316   :  { %2101 = vrcp.f32 %v613_v36  ;;  %v616_v58 = vpop.xlane.xlu0 %615  ;;  %v641_v30 = vmul.f32 %v2092_v26, %v2582_v28 }
 0x317   :  { %2103 = vrcp.f32 %v616_v58  ;;  %1881 = vmatmul.mubr.msk.f32.gmra.mrb[6].mxu0 %vm487_vm2, %v639_v41 }
 0x318   :  { %v2094_v9 = vpop.eup %2093  ;;  %1883 = vmatprep.mubr.msk.f32.mxu0 %vm487_vm2, %v641_v30 }
 0x319   :  { %v2096_v45 = vpop.eup %2095  ;;  %v619_v49 = vpop.xlane.xlu1 %618  ;;  %v643_v27 = vmul.f32 %v2094_v9, %v2590_v37 }
 0x31a   :  { %2105 = vrcp.f32 %v619_v49  ;;  %v622_v14 = vpop.xlane.xlu0 %621  ;;  %v645_v19 = vmul.f32 %v2096_v45, %v2592_v44 }
 0x31b   :  { %2107 = vrcp.f32 %v622_v14  ;;  %1884 = vmatmul.mubr.msk.f32.gmra.mrb[8].mxu0 %vm487_vm2, %v643_v27 }
 0x31c   :  { %v2098_v20 = vpop.eup %2097  ;;  %1886 = vmatprep.mubr.msk.f32.mxu0 %vm487_vm2, %v645_v19 }
 0x31d   :  { %v2100_v28 = vpop.eup %2099  ;;  %v625_v52 = vpop.xlane.xlu1 %624  ;;  %v647_v56 = vmul.f32 %v2098_v20, %v2600_v53 }
 0x31e   :  { %2109 = vrcp.f32 %v625_v52  ;;  %v628_v62 = vpop.xlane.xlu0 %627  ;;  %v649_v60 = vmul.f32 %v2100_v28, %v2602_v57 }
 0x31f   :  { %2111 = vrcp.f32 %v628_v62  ;;  %1887 = vmatmul.mubr.msk.f32.gmra.mrb[10].mxu0 %vm487_vm2, %v647_v56 }
 0x320   :  { %v2102_v37 = vpop.eup %2101  ;;  %1889 = vmatprep.mubr.msk.f32.mxu0 %vm487_vm2, %v649_v60 }
 0x321   :  { %v2104_v44 = vpop.eup %2103  ;;  %v631_v61 = vpop.xlane.xlu1 %630  ;;  %v651_v4 = vmul.f32 %v2102_v37, %v2610_v1 }
 0x322   :  { %2113 = vrcp.f32 %v631_v61  ;;  %v1199_v25 = vpop.xlane.xlu0 %1198  ;;  %v653_v7 = vmul.f32 %v2104_v44, %v2612_v31 }
 0x323   :  { %2115 = vrcp.f32 %v1199_v25  ;;  %1890 = vmatmul.mubr.msk.f32.gmra.mrb[12].mxu0 %vm487_vm2, %v651_v4 }
 0x324   :  { %v2106_v53 = vpop.eup %2105  ;;  %1892 = vmatprep.mubr.msk.f32.mxu0 %vm487_vm2, %v653_v7  ;;  %v1510_v7 = vld [vmem:[%s2899_s7 + $0x20] sm:$0xff] }
 0x325   :  { %v2108_v57 = vpop.eup %2107  ;;  %v1202_v5 = vpop.xlane.xlu1 %1201  ;;  %v655_v8 = vmul.f32 %v2106_v53, %v2620_v13  ;;  %v1511_v53 = vld [vmem:[%s2899_s7 + $0x28] sm:$0xff] }
 0x326   :  { %2117 = vrcp.f32 %v1202_v5  ;;  %v1205_v50 = vpop.xlane.xlu0 %1204  ;;  %v657_v12 = vmul.f32 %v2108_v57, %v2622_v34  ;;  %v2007_v57 = vpack.c.bf16 %v1511_v53, %v1510_v7  ;;  %v1512_v5 = vld [vmem:[%s2899_s7 + $0x30] sm:$0xff] }
 0x327   :  { %2119 = vrcp.f32 %v1205_v50  ;;  %1893 = vmatmul.mubr.msk.f32.gmra.mrb[14].mxu0 %vm487_vm2, %v655_v8  ;;  %v1513_v8 = vld [vmem:[%s2899_s7 + $0x38] sm:$0xff]  ;;  %v2162_v7 = vld [vmem:[%s2894_s2 + $0x70] sm:$0xff] }
 0x328   :  { %v2110_v1 = vpop.eup %2109  ;;  %1895 = vmatprep.mubr.msk.f32.mxu0 %vm487_vm2, %v657_v12  ;;  %v2011_v50 = vpack.c.bf16 %v1513_v8, %v1512_v5 }
 0x329   :  { %v2112_v31 = vpop.eup %2111  ;;  %v1208_v16 = vpop.xlane.xlu1 %1207  ;;  %v659_v17 = vmul.f32 %v2110_v1, %v2630_v32 }
 0x32a   :  { %2121 = vrcp.f32 %v1208_v16  ;;  %v1211_v6 = vpop.xlane.xlu0 %1210  ;;  %v661_v11 = vmul.f32 %v2112_v31, %v2632_v43  ;;  %v2809_v16 = vld [vmem:[%s2894_s2 + $0x8] sm:$0xff] }
 0x32b   :  { %2123 = vrcp.f32 %v1211_v6  ;;  %1896 = vmatmul.mubr.msk.f32.gmra.mrb[16].mxu0 %vm487_vm2, %v659_v17  ;;  %v2815_v6 = vld [vmem:[%s2894_s2 + $0x18] sm:$0xff] }
 0x32c   :  { %v2114_v13 = vpop.eup %2113  ;;  %1898 = vmatprep.mubr.msk.f32.mxu0 %vm487_vm2, %v661_v11 }
 0x32d   :  { %v2116_v34 = vpop.eup %2115  ;;  %v1214_v39 = vpop.xlane.xlu1 %1213  ;;  %v663_v24 = vmul.f32 %v2114_v13, %v2640_v48 }
 0x32e   :  { %2125 = vrcp.f32 %v1214_v39  ;;  %v1217_v54 = vpop.xlane.xlu0 %1216  ;;  %v1246_v29 = vmul.f32 %v2116_v34, %v2642_v47  ;;  %v2149_v34 = vld [vmem:[%s2894_s2] sm:$0xff] }
 0x32f   :  { %2127 = vrcp.f32 %v1217_v54  ;;  %1899 = vmatmul.mubr.msk.f32.gmra.mrb[18].mxu0 %vm487_vm2, %v663_v24  ;;  %v2150_v24 = vld [vmem:[%s2894_s2 + $0x10] sm:$0xff] }
 0x330   :  { %v2118_v32 = vpop.eup %2117  ;;  %1929 = vmatprep.mubr.msk.f32.mxu0 %vm487_vm2, %v1246_v29 }
 0x331   :  { %v2120_v43 = vpop.eup %2119  ;;  %v1248_v33 = vmul.f32 %v2118_v32, %v2650_v22  ;;  %v1220_v38 = vpop.xlane.xlu1 %1219 }
 0x332   :  { %2129 = vrcp.f32 %v1220_v38  ;;  %v1223_v10 = vpop.xlane.xlu0 %1222  ;;  %v1250_v15 = vmul.f32 %v2120_v43, %v2652_v51 }
 0x333   :  { %2131 = vrcp.f32 %v1223_v10  ;;  %1930 = vmatmul.mubr.msk.f32.vlgmr.msra.gmra.mrb[20].mxu0 %vm487_vm2, %v1248_v33  ;;  %v2151_v33 = vld [vmem:[%s2894_s2 + $0x28] sm:$0xff] }
 0x334   :  { %v2122_v48 = vpop.eup %2121  ;;  %1932 = vmatprep.mubr.msk.f32.mxu0 %vm487_vm2, %v1250_v15  ;;  %v2152_v15 = vld [vmem:[%s2894_s2 + $0x20] sm:$0xff] }
 0x335   :  { %v2124_v47 = vpop.eup %2123  ;;  %v1226_v26 = vpop.xlane.xlu1 %1225  ;;  %v1252_v36 = vmul.f32 %v2122_v48, %v2660_v35 }
 0x336   :  { %2133 = vrcp.f32 %v1226_v26  ;;  %v1229_v41 = vpop.xlane.xlu0 %1228  ;;  %v1254_v58 = vmul.f32 %v2124_v47, %v2662_v55 }
 0x337   :  { %2135 = vrcp.f32 %v1229_v41  ;;  %1933 = vmatmul.mubr.msk.f32.gmra.mrb[22].mxu0 %vm487_vm2, %v1252_v36  ;;  %v2153_v41 = vld [vmem:[%s2894_s2 + $0x38] sm:$0xff] }
 0x338   :  { %v2126_v22 = vpop.eup %2125  ;;  %1935 = vmatprep.mubr.msk.f32.mxu0 %vm487_vm2, %v1254_v58 }
 0x339   :  { %v2128_v51 = vpop.eup %2127  ;;  %v1232_v30 = vpop.xlane.xlu1 %1231  ;;  %v1256_v9 = vmul.f32 %v2126_v22, %v2670_v21 }
 0x33a   :  { %2137 = vrcp.f32 %v1232_v30  ;;  %v1235_v45 = vpop.xlane.xlu0 %1234  ;;  %v1258_v49 = vmul.f32 %v2128_v51, %v2672_v59  ;;  %v2154_v51 = vld [vmem:[%s2894_s2 + $0x30] sm:$0xff] }
 0x33b   :  { %2139 = vrcp.f32 %v1235_v45  ;;  %1936 = vmatmul.mubr.msk.f32.gmra.mrb[24].mxu0 %vm487_vm2, %v1256_v9 }
 0x33c   :  { %v2130_v35 = vpop.eup %2129  ;;  %1938 = vmatprep.mubr.msk.f32.mxu0 %vm487_vm2, %v1258_v49 }
 0x33d   :  { %v2132_v55 = vpop.eup %2131  ;;  %v1238_v27 = vpop.xlane.xlu1 %1237  ;;  %v1260_v14 = vmul.f32 %v2130_v35, %v2680_v40  ;;  %v2155_v35 = vld [vmem:[%s2894_s2 + $0x48] sm:$0xff] }
 0x33e   :  { %2141 = vrcp.f32 %v1238_v27  ;;  %v1241_v19 = vpop.xlane.xlu0 %1240  ;;  %v1262_v20 = vmul.f32 %v2132_v55, %v2682_v63 }
 0x33f   :  { %2143 = vrcp.f32 %v1241_v19  ;;  %1939 = vmatmul.mubr.msk.f32.gmra.mrb[26].mxu0 %vm487_vm2, %v1260_v14  ;;  %v2156_v14 = vld [vmem:[%s2894_s2 + $0x40] sm:$0xff] }
 0x340   :  { %v2134_v21 = vpop.eup %2133  ;;  %1941 = vmatprep.mubr.msk.f32.mxu0 %vm487_vm2, %v1262_v20 }
 0x341   :  { %v2136_v59 = vpop.eup %2135  ;;  %v1244_v28 = vpop.xlane.xlu1 %1243  ;;  %v1264_v52 = vmul.f32 %v2134_v21, %v2689_v42 }
 0x342   :  { %2145 = vrcp.f32 %v1244_v28  ;;  %v1266_v56 = vmul.f32 %v2136_v59, %v2691_v23  ;;  %v2157_v28 = vld [vmem:[%s2894_s2 + $0x58] sm:$0xff] }
 0x343   :  { %1942 = vmatmul.mubr.msk.f32.gmra.mrb[28].mxu0 %vm487_vm2, %v1264_v52 }
 0x344   :  { %v2138_v40 = vpop.eup %2137  ;;  %1944 = vmatprep.mubr.msk.f32.mxu0 %vm487_vm2, %v1266_v56 }
 0x345   :  { %v2140_v62 = vpop.eup %2139  ;;  %v1268_v63 = vmul.f32 %v2138_v40, %v2697_v18  ;;  %v1506_v18 = vld [vmem:[%s2899_s7] sm:$0xff]  ;;  %v2158_v40 = vld [vmem:[%s2894_s2 + $0x50] sm:$0xff] }
 0x346   :  { %v1270_v60 = vmul.f32 %v2140_v62, %v2699_v3  ;;  %v1507_v3 = vld [vmem:[%s2899_s7 + $0x8] sm:$0xff] }
 0x347   :  { %1945 = vmatmul.mubr.msk.f32.gmra.mrb[30].mxu0 %vm487_vm2, %v1268_v63 }
 0x348   :  { %v2142_v37 = vpop.eup %2141  ;;  %1947 = vmatprep.mubr.msk.f32.mxu0 %vm487_vm2, %v1270_v60 }
 0x349   :  { %v2144_v44 = vpop.eup %2143  ;;  %v1272_v42 = vmul.f32 %v2142_v37, %v2705_v46  ;;  %v1999_v46 = vpack.c.bf16 %v1507_v3, %v1506_v18 }
 0x34a   :  { %v1274_v23 = vmul.f32 %v2144_v44, %v2707_v0  ;;  %v1508_v0 = vld [vmem:[%s2899_s7 + $0x10] sm:$0xff]  ;;  %v2159_v44 = vld [vmem:[%s2894_s2 + $0x68] sm:$0xff] }
 0x34b   :  { %1948 = vmatmul.mubr.msk.f32.gmra.mrb[32].mxu0 %vm487_vm2, %v1272_v42  ;;  %2000 = vmatprep.subr.bf16.mxu1 %v1999_v46 }
 0x34c   :  { %v2146_v61 = vpop.eup %2145  ;;  %1950 = vmatprep.mubr.msk.f32.mxu0 %vm487_vm2, %v1274_v23  ;;  %2002 = vmatpush3.bf16.msra.mxu1 %v1999_v46 }
 0x34d   :  { %v1276_v4 = vmul.f32 %v2146_v61, %v2713_v2  ;;  %v1509_v2 = vld [vmem:[%s2899_s7 + $0x18] sm:$0xff]  ;;  %v2160_v61 = vld [vmem:[%s2894_s2 + $0x60] sm:$0xff] }
 0x34e   :  { %v2003_v25 = vpack.c.bf16 %v1509_v2, %v1508_v0  ;;  %v2161_v0 = vld [vmem:[%s2894_s2 + $0x78] sm:$0xff] }
 0x34f   :  { %1951 = vmatmul.mubr.msk.f32.gmra.mrb[34].mxu0 %vm487_vm2, %v1276_v4 }
 0x350   :  { %2004 = vmatprep.subr.bf16.mxu1 %v2003_v25 }
 0x351   :  { %2006 = vmatpush3.bf16.msra.mxu1 %v2003_v25 }
 0x352   :  { %2008 = vmatprep.subr.bf16.mxu1 %v2007_v57 }
 0x355   :  { %2010 = vmatpush3.bf16.msra.mxu1 %v2007_v57 }
 0x356   :  { %2012 = vmatprep.subr.bf16.mxu1 %v2011_v50 }
 0x359   :  { %2014 = vmatpush3.bf16.msra.mxu1 %v2011_v50 }
 0x3e6   :  { %v1879_v12 = vpop.f32.mrb[4].mxu0 }
 0x3e7   :  { %v778_v1 = vpop.f32.mrb[5].mxu0  ;;  %v858_v17 = vmul.f32 %v2809_v16, %v1879_v12 }
 0x3e8   :  { %v857_v39 = vmul.f32 %v2149_v34, %v778_v1 }
 0x3ea   :  { %v1882_v31 = vpop.f32.mrb[6].mxu0 }
 0x3eb   :  { %v860_v11 = vmul.f32 %v2815_v6, %v1882_v31  ;;  %v788_v13 = vpop.f32.mrb[7].mxu0 }
 0x3ec   :  { %v859_v54 = vmul.f32 %v2150_v24, %v788_v13 }
 0x3ed   :  { %v874_v29 = vadd.f32 %v860_v11, %v858_v17 }
 0x3ee   :  { %v873_v32 = vadd.f32 %v859_v54, %v857_v39  ;;  %v1885_v43 = vpop.f32.mrb[8].mxu0 }
 0x3ef   :  { %v862_v38 = vmul.f32 %v2151_v33, %v1885_v43  ;;  %v798_v10 = vpop.f32.mrb[9].mxu0 }
 0x3f0   :  { %v861_v48 = vmul.f32 %v2152_v15, %v798_v10 }
 0x3f1   :  { %v876_v47 = vadd.f32 %v874_v29, %v862_v38 }
 0x3f2   :  { %v875_v26 = vadd.f32 %v873_v32, %v861_v48  ;;  %v1888_v36 = vpop.f32.mrb[10].mxu0 }
 0x3f3   :  { %v864_v58 = vmul.f32 %v2153_v41, %v1888_v36  ;;  %v808_v22 = vpop.f32.mrb[11].mxu0 }
 0x3f4   :  { %v863_v30 = vmul.f32 %v2154_v51, %v808_v22 }
 0x3f5   :  { %v878_v9 = vadd.f32 %v876_v47, %v864_v58 }
 0x3f6   :  { %v877_v45 = vadd.f32 %v875_v26, %v863_v30  ;;  %v1891_v49 = vpop.f32.mrb[12].mxu0 }
 0x3f7   :  { %v866_v55 = vmul.f32 %v2155_v35, %v1891_v49  ;;  %v818_v27 = vpop.f32.mrb[13].mxu0 }
 0x3f8   :  { %v865_v19 = vmul.f32 %v2156_v14, %v818_v27 }
 0x3f9   :  { %v880_v20 = vadd.f32 %v878_v9, %v866_v55 }
 0x3fa   :  { %v879_v21 = vadd.f32 %v877_v45, %v865_v19  ;;  %v1894_v59 = vpop.f32.mrb[14].mxu0 }
 0x3fb   :  { %v868_v52 = vmul.f32 %v2157_v28, %v1894_v59  ;;  %v828_v56 = vpop.f32.mrb[15].mxu0 }
 0x3fc   :  { %v867_v62 = vmul.f32 %v2158_v40, %v828_v56 }
 0x3fd   :  { %v882_v63 = vadd.f32 %v880_v20, %v868_v52 }
 0x3fe   :  { %v881_v60 = vadd.f32 %v879_v21, %v867_v62  ;;  %v1897_v37 = vpop.f32.mrb[16].mxu0 }
 0x3ff   :  { %v870_v42 = vmul.f32 %v2159_v44, %v1897_v37  ;;  %v838_v23 = vpop.f32.mrb[17].mxu0 }
 0x400   :  { %v869_v4 = vmul.f32 %v2160_v61, %v838_v23 }
 0x401   :  { %v884_v18 = vadd.f32 %v882_v63, %v870_v42 }
 0x402   :  { %v883_v3 = vadd.f32 %v881_v60, %v869_v4  ;;  %v1900_v46 = vpop.f32.mrb[18].mxu0 }
 0x403   :  { %v872_v2 = vmul.f32 %v2161_v0, %v1900_v46  ;;  %v848_v25 = vpop.f32.mrb[19].mxu0 }
 0x404   :  { %v871_v53 = vmul.f32 %v2162_v7, %v848_v25 }
 0x405   :  { %v886_v57 = vadd.f32 %v884_v18, %v872_v2 }
 0x406   :  { %v885_v5 = vadd.f32 %v883_v3, %v871_v53  ;;  %v1931_v8 = vpop.f32.mrb[20].mxu0 }
 0x407   :  { %888 = vst.msk [vmem:[#allocation2 + $0x8] sm:$0xff] %vm68_vm1, %v886_v57  ;;  %v1391_v50 = vpop.f32.mrb[21].mxu0  ;;  %v1471_v1 = vmul.f32 %v2809_v16, %v1931_v8 }
 0x408   :  { %887 = vst.msk [vmem:[#allocation2] sm:$0xff] %vm68_vm1, %v885_v5  ;;  %v1470_v11 = vmul.f32 %v2149_v34, %v1391_v50 }
 0x40a   :  { %v1934_v12 = vpop.f32.mrb[22].mxu0 }
 0x40b   :  { %v1473_v31 = vmul.f32 %v2815_v6, %v1934_v12  ;;  %v1401_v17 = vpop.f32.mrb[23].mxu0 }
 0x40c   :  { %v1472_v13 = vmul.f32 %v2150_v24, %v1401_v17 }
 0x40d   :  { %v1487_v39 = vadd.f32 %v1473_v31, %v1471_v1 }
 0x40e   :  { %v1486_v54 = vadd.f32 %v1472_v13, %v1470_v11  ;;  %v1937_v29 = vpop.f32.mrb[24].mxu0  ;;  %v1503_v48 = vld [vmem:[#allocation2 + $0x8] sm:$0xff] }
 0x40f   :  { %v1475_v32 = vmul.f32 %v2151_v33, %v1937_v29  ;;  %v1411_v43 = vpop.f32.mrb[25].mxu0  ;;  %v1502_v38 = vld [vmem:[#allocation2] sm:$0xff] }
 0x410   :  { %v1474_v10 = vmul.f32 %v2152_v15, %v1411_v43  ;;  %1969 = vmatprep.mubr.msk.f32.mxu1 %vm68_vm1, %v1502_v38 }
 0x411   :  { %v1489_v47 = vadd.f32 %v1487_v39, %v1475_v32  ;;  %1970 = vmatmul.mubr.msk.f32.vlgmr.msra.gmra.mrb[34].mxu1 %vm68_vm1, %v1503_v48 }
 0x412   :  { %v1488_v26 = vadd.f32 %v1486_v54, %v1474_v10  ;;  %v1940_v16 = vpop.f32.mrb[26].mxu0 }
 0x413   :  { %v1477_v36 = vmul.f32 %v2153_v41, %v1940_v16  ;;  %v1421_v6 = vpop.f32.mrb[27].mxu0 }
 0x414   :  { %v1476_v58 = vmul.f32 %v2154_v51, %v1421_v6 }
 0x415   :  { %v1491_v34 = vadd.f32 %v1489_v47, %v1477_v36 }
 0x416   :  { %v1490_v24 = vadd.f32 %v1488_v26, %v1476_v58  ;;  %v1943_v22 = vpop.f32.mrb[28].mxu0 }
 0x417   :  { %v1479_v30 = vmul.f32 %v2155_v35, %v1943_v22  ;;  %v1431_v9 = vpop.f32.mrb[29].mxu0 }
 0x418   :  { %v1478_v33 = vmul.f32 %v2156_v14, %v1431_v9 }
 0x419   :  { %v1493_v45 = vadd.f32 %v1491_v34, %v1479_v30 }
 0x41a   :  { %v1492_v49 = vadd.f32 %v1490_v24, %v1478_v33  ;;  %v1946_v15 = vpop.f32.mrb[30].mxu0 }
 0x41b   :  { %v1481_v55 = vmul.f32 %v2157_v28, %v1946_v15  ;;  %v1441_v27 = vpop.f32.mrb[31].mxu0 }
 0x41c   :  { %v1480_v19 = vmul.f32 %v2158_v40, %v1441_v27 }
 0x41d   :  { %v1495_v20 = vadd.f32 %v1493_v45, %v1481_v55 }
 0x41e   :  { %v1494_v21 = vadd.f32 %v1492_v49, %v1480_v19  ;;  %v1949_v59 = vpop.f32.mrb[32].mxu0 }
 0x41f   :  { %v1483_v52 = vmul.f32 %v2159_v44, %v1949_v59  ;;  %v1451_v56 = vpop.f32.mrb[33].mxu0  ;;  %v1713_v44 = vld [vmem:[%s2900_s8] ss:$0 sm:$0xff]  ;;  %s2185_s8 = scalar_lea.vmem %s1628_s17, 512 }
 0x420   :  { %v1482_v41 = vmul.f32 %v2160_v61, %v1451_v56  ;;  %p2186_p8 = scmp.ne.s32.totalorder %s1628_s17, %s2185_s8  ;;  %p2191_p10 = scmp.lt.s32.totalorder %s2185_s8, %s2185_s8 }
 0x421   :  { %v1497_v62 = vadd.f32 %v1495_v20, %v1483_v52 }
 0x422   :  { %v1496_v51 = vadd.f32 %v1494_v21, %v1482_v41  ;;  %v1952_v63 = vpop.f32.mrb[34].mxu0  ;;  %p2192_p11 = por %p2191_p10, %p2190_p9 }
 0x423   :  { %v1485_v60 = vmul.f32 %v2161_v0, %v1952_v63  ;;  %v1461_v37 = vpop.f32.mrb[35].mxu0 }
 0x424   :  { %v1484_v35 = vmul.f32 %v2162_v7, %v1461_v37  ;;  %p2193_p12 = pnand %p2192_p11, %p2186_p8 }
 0x425   :  { %v1499_v42 = vadd.f32 %v1497_v62, %v1485_v60 }
 0x426   :  { %v1498_v14 = vadd.f32 %v1496_v51, %v1484_v35 }
 0x427   :  { %1501 = vst.msk [vmem:[#allocation2 + $0x18] sm:$0xff] %vm68_vm1, %v1499_v42 }
 0x428   :  { %1500 = vst.msk [vmem:[#allocation2 + $0x10] sm:$0xff] %vm68_vm1, %v1498_v14 }
 0x42e   :  { %v1505_v40 = vld [vmem:[#allocation2 + $0x18] sm:$0xff] }
 0x42f   :  { %v1504_v28 = vld [vmem:[#allocation2 + $0x10] sm:$0xff] }
 0x430   :  { %1972 = vmatprep.mubr.msk.f32.mxu1 %vm68_vm1, %v1504_v28 }
 0x431   :  { %1973 = vmatmul.mubr.msk.f32.gmra.mrb[36].mxu1 %vm68_vm1, %v1505_v40 }
 0x4e4   :  { %v1971_v23 = vpop.f32.mrb[34].mxu1 }
 0x4e5   :  { %v1605_v61 = vadd.f32 %v1971_v23, %v1713_v44  ;;  %v1599_v4 = vpop.f32.mrb[35].mxu1 }
 0x4e6   :  { %v1600_v18 = vadd.f32 %v1713_v44, %v1599_v4 }
 0x4e7   :  { %1619 = vst.msk [vmem:[#allocation6 + $0x8] sm:$0xff] %vm68_vm1, %v1605_v61 }
 0x4e8   :  { %1618 = vst.msk [vmem:[#allocation6] sm:$0xff] %vm68_vm1, %v1600_v18 }
 0x504   :  { %v1974_v3 = vpop.f32.mrb[36].mxu1 }
 0x505   :  { %v1615_v46 = vadd.f32 %v1974_v3, %v1713_v44  ;;  %v1609_v0 = vpop.f32.mrb[37].mxu1 }
 0x506   :  { %v1610_v2 = vadd.f32 %v1713_v44, %v1609_v0 }
 0x507   :  { %1621 = vst.msk [vmem:[#allocation6 + $0x18] sm:$0xff] %vm68_vm1, %v1615_v46 }
 0x508   :  { %1620 = vst.msk [vmem:[#allocation6 + $0x10] sm:$0xff] %vm68_vm1, %v1610_v2 }
 0x509   :  { %2196 = shalt.err (!%p2193_p12)
}
 0x50a   :  { %s2197_s22 = scalar_lea.hbm %s2901_s9, 512 }
 0x50b   :  { %p2198_p13 = scmp.ne.s32.totalorder %s2901_s9, %s2197_s22  ;;  %p2201_p0 = scmp.lt.u32.totalorder %s2197_s22, %s2901_s9 }
 0x50d   :  { %p2203_p1 = pnand %p2201_p0, %p2198_p13 }
 0x50f   :  { %2206 = shalt.err (!%p2203_p1)
}
 0x510   :  { %1633 = dma.vmem_to_hbm [thread:$0]  %s1628_s17, 512, %s2901_s9, [#allocation5], %s2212_s19, %s2212_s19, %s2213_s20  }
 0x511   :  { %2209 = dma.done.wait [#allocation5], 512  }
 0x512   :  { %2210 = vsyncadd [#allocation5], 4294966784 }
 0x513   :  { %1637 = vsyncpa [#allocation4], 1 }
 0x514   :  { %1638 = vsyncpa [#allocation5], 1 }

</bundles_post_ra>
